<compile_context>
chip_gen: v5e
topology: v5e:2x2
jax: 0.10.0
libtpu: 0.0.40
codegen_flags: <defaults>
</compile_context>

<pallas_src>
import jax
import jax.numpy as jnp
from jax import lax
from jax.experimental import pallas as pl
from jax.experimental.pallas import tpu as pltpu

LANE = 128       # lane width
SUB = 8          # sublane width
TILE_M = 256     # node-row tile (SAGE layers)
TILE_K = 256     # adjacency reduction tile (large-N fallback only)
TILE_DM = 256    # decoder output row tile
TILE_DN = 256    # decoder output column tile

VMEM_LIMIT = 32 * 1024 * 1024        # scoped VMEM limit handed to Mosaic
RESIDENT_BUDGET = 24 * 1024 * 1024   # conservative residency budget (v7x headroom)


def _round_up(x, m):
    return (x + m - 1) // m * m


def _pad2(a, rows, cols):
    return jnp.pad(a, ((0, rows - a.shape[0]), (0, cols - a.shape[1])))


# --------------------------------------------------------------------------
# SAGE mean-aggregator layer:  out = relu(X @ Ws + (A @ X) @ Wn + b)
# --------------------------------------------------------------------------
def _sage_resident_kernel(adj_ref, x_ref, ws_ref, wn_ref, b_ref, o_ref):
    # X is fully VMEM-resident: slice the self rows from it instead of
    # restreaming X from HBM, and do the full-K aggregation in one MXU call.
    i = pl.program_id(0)
    row0 = pl.multiple_of(i * TILE_M, TILE_M)
    xs = x_ref[pl.ds(row0, TILE_M), :]
    agg = jnp.dot(adj_ref[...], x_ref[...],
                  preferred_element_type=jnp.float32)   # row-normalized mean
    h = (jnp.dot(xs, ws_ref[...], preferred_element_type=jnp.float32)
         + jnp.dot(agg.astype(jnp.bfloat16), wn_ref[...],
                   preferred_element_type=jnp.float32)
         + b_ref[0:1, :])
    o_ref[...] = jnp.maximum(h, 0.0).astype(o_ref.dtype)


def _sage_tiled_kernel(adj_ref, xs_ref, xn_ref, ws_ref, wn_ref, b_ref,
                       o_ref, acc_ref):
    # Large-N fallback: reduction over adjacency-column tiles, f32 accumulator.
    k = pl.program_id(1)

    @pl.when(k == 0)
    def _():
        acc_ref[...] = jnp.zeros_like(acc_ref)

    acc_ref[...] += jnp.dot(adj_ref[...], xn_ref[...],
                            preferred_element_type=jnp.float32)

    @pl.when(k == pl.num_programs(1) - 1)
    def _():
        h = (jnp.dot(xs_ref[...], ws_ref[...],
                     preferred_element_type=jnp.float32)
             + jnp.dot(acc_ref[...].astype(jnp.bfloat16), wn_ref[...],
                       preferred_element_type=jnp.float32)
             + b_ref[0:1, :])
        o_ref[...] = jnp.maximum(h, 0.0).astype(o_ref.dtype)


def sage_layer(adj, x, ws, wn, b):
    n_pad = adj.shape[0]
    f_in = x.shape[1]
    f_out = ws.shape[1]

    # Residency budget (count every operand double-buffered, to be safe).
    resident_bytes = 2 * (n_pad * f_in * 2        # resident X (bf16)
                          + TILE_M * n_pad * 2    # adjacency row stripe
                          + TILE_M * f_out * 2    # output tile
                          + 2 * f_in * f_out * 2  # Ws + Wn
                          + SUB * f_out * 4)      # bias (f32)

    if resident_bytes <= RESIDENT_BUDGET:
        grid = (n_pad // TILE_M,)
        return pl.pallas_call(
            _sage_resident_kernel,
            out_shape=jax.ShapeDtypeStruct((n_pad, f_out), jnp.bfloat16),
            grid=grid,
            in_specs=[
                pl.BlockSpec((TILE_M, n_pad), lambda i: (i, 0)),  # adj stripe
                pl.BlockSpec((n_pad, f_in), lambda i: (0, 0)),    # X resident
                pl.BlockSpec((f_in, f_out), lambda i: (0, 0)),    # Ws resident
                pl.BlockSpec((f_in, f_out), lambda i: (0, 0)),    # Wn resident
                pl.BlockSpec((SUB, f_out), lambda i: (0, 0)),     # bias
            ],
            out_specs=pl.BlockSpec((TILE_M, f_out), lambda i: (i, 0)),
            compiler_params=pltpu.CompilerParams(
                dimension_semantics=("parallel",),
                vmem_limit_bytes=VMEM_LIMIT),
        )(adj, x, ws, wn, b)

    # TODO(synk): for real graph sizes replace this dense A @ X fallback with a
    # scalar-prefetched neighbor-index gather (fanout nonzeros per row).
    grid = (n_pad // TILE_M, n_pad // TILE_K)
    return pl.pallas_call(
        _sage_tiled_kernel,
        out_shape=jax.ShapeDtypeStruct((n_pad, f_out), jnp.bfloat16),
        grid=grid,
        in_specs=[
            pl.BlockSpec((TILE_M, TILE_K), lambda i, k: (i, k)),  # adj tile
            pl.BlockSpec((TILE_M, f_in), lambda i, k: (i, 0)),    # self rows
            pl.BlockSpec((TILE_K, f_in), lambda i, k: (k, 0)),    # neigh rows
            pl.BlockSpec((f_in, f_out), lambda i, k: (0, 0)),     # Ws
            pl.BlockSpec((f_in, f_out), lambda i, k: (0, 0)),     # Wn
            pl.BlockSpec((SUB, f_out), lambda i, k: (0, 0)),      # bias
        ],
        out_specs=pl.BlockSpec((TILE_M, f_out), lambda i, k: (i, 0)),
        scratch_shapes=[pltpu.VMEM((TILE_M, f_in), jnp.float32)],
        compiler_params=pltpu.CompilerParams(
            dimension_semantics=("parallel", "arbitrary"),
            vmem_limit_bytes=VMEM_LIMIT),
    )(adj, x, x, ws, wn, b)


# --------------------------------------------------------------------------
# Decoder:  out[i, j] = sigmoid(z_i . z_j)
# --------------------------------------------------------------------------
def _sigmoid_single_eup(logits_f32):
    # sigmoid(x) = 0.5 * (tanh(x / 2) + 1): one EUP op instead of exp + rcp.
    return 0.5 * (jnp.tanh(0.5 * logits_f32) + 1.0)


def _decode_resident_kernel(z_ref, o_ref):
    # Z is fully VMEM-resident; both operand tiles are sliced from it.
    i = pl.program_id(0)
    j = pl.program_id(1)
    zi = z_ref[pl.ds(pl.multiple_of(i * TILE_DM, TILE_DM), TILE_DM), :]
    zj = z_ref[pl.ds(pl.multiple_of(j * TILE_DN, TILE_DN), TILE_DN), :]
    logits = lax.dot_general(
        zi, zj, dimension_numbers=(((1,), (1,)), ((), ())),
        preferred_element_type=jnp.float32)
    o_ref[...] = _sigmoid_single_eup(logits).astype(o_ref.dtype)


def _decode_tiled_kernel(zi_ref, zj_ref, o_ref):
    logits = lax.dot_general(
        zi_ref[...], zj_ref[...], dimension_numbers=(((1,), (1,)), ((), ())),
        preferred_element_type=jnp.float32)
    o_ref[...] = _sigmoid_single_eup(logits).astype(o_ref.dtype)


def decode(z):
    n_pad, h = z.shape
    grid = (n_pad // TILE_DM, n_pad // TILE_DN)
    resident_bytes = 2 * (n_pad * h * 2 + TILE_DM * TILE_DN * 2)

    if resident_bytes <= RESIDENT_BUDGET:
        return pl.pallas_call(
            _decode_resident_kernel,
            out_shape=jax.ShapeDtypeStruct((n_pad, n_pad), jnp.bfloat16),
            grid=grid,
            in_specs=[pl.BlockSpec((n_pad, h), lambda i, j: (0, 0))],
            out_specs=pl.BlockSpec((TILE_DM, TILE_DN), lambda i, j: (i, j)),
            compiler_params=pltpu.CompilerParams(
                dimension_semantics=("parallel", "parallel"),
                vmem_limit_bytes=VMEM_LIMIT),
        )(z)

    return pl.pallas_call(
        _decode_tiled_kernel,
        out_shape=jax.ShapeDtypeStruct((n_pad, n_pad), jnp.bfloat16),
        grid=grid,
        in_specs=[
            pl.BlockSpec((TILE_DM, h), lambda i, j: (i, 0)),
            pl.BlockSpec((TILE_DN, h), lambda i, j: (j, 0)),
        ],
        out_specs=pl.BlockSpec((TILE_DM, TILE_DN), lambda i, j: (i, j)),
        compiler_params=pltpu.CompilerParams(
            dimension_semantics=("parallel", "parallel"),
            vmem_limit_bytes=VMEM_LIMIT),
    )(z, z)


# --------------------------------------------------------------------------
# One-time host-side padding / casting (hoisted out of the jitted forward).
# --------------------------------------------------------------------------
def pad_graphsage_params(adj_norm, feats, ws1, wn1, b1, ws2, wn2, b2):
    n = feats.shape[0]
    n_pad = _round_up(max(n, TILE_M), TILE_M)
    f_in = _round_up(feats.shape[1], LANE)
    h1p = _round_up(ws1.shape[1], LANE)
    h2p = _round_up(ws2.shape[1], LANE)

    bf = jnp.bfloat16
    padded = dict(
        adj=_pad2(adj_norm, n_pad, n_pad).astype(bf),
        x=_pad2(feats, n_pad, f_in).astype(bf),
        ws1=_pad2(ws1, f_in, h1p).astype(bf),
        wn1=_pad2(wn1, f_in, h1p).astype(bf),
        b1=jnp.broadcast_to(_pad2(b1, 1, h1p), (SUB, h1p)).astype(jnp.float32),
        ws2=_pad2(ws2, h1p, h2p).astype(bf),
        wn2=_pad2(wn2, h1p, h2p).astype(bf),
        b2=jnp.broadcast_to(_pad2(b2, 1, h2p), (SUB, h2p)).astype(jnp.float32),
    )
    return n, n_pad, padded


# --------------------------------------------------------------------------
# Full forward pass (takes pre-padded bf16 operands; returns padded bf16 out).
# --------------------------------------------------------------------------
@jax.jit
def graphsage_forward_padded(adj_p, x_p, ws1_p, wn1_p, b1_p, ws2_p, wn2_p, b2_p):
    h1 = sage_layer(adj_p, x_p, ws1_p, wn1_p, b1_p)    # (n_pad, h1p) bf16
    # dropout: eval mode -> identity (nn.Dropout is a no-op at inference)
    z = sage_layer(adj_p, h1, ws2_p, wn2_p, b2_p)      # (n_pad, h2p) bf16
    return decode(z)                                   # (n_pad, n_pad) bf16


def reference_forward(adj_norm, feats, ws1, wn1, b1, ws2, wn2, b2):
    agg1 = adj_norm @ feats
    h1 = jnp.maximum(feats @ ws1 + agg1 @ wn1 + b1, 0.0)
    agg2 = adj_norm @ h1
    z = jnp.maximum(h1 @ ws2 + agg2 @ wn2 + b2, 0.0)
    return jax.nn.sigmoid(z @ z.T)


def build_sampled_adjacency(key, num_nodes, num_neighbors):
    """Deterministic stand-in for dgl.sampling.sample_neighbors: each node gets
    `num_neighbors` distinct neighbors; returns the row-normalized (mean)
    adjacency so that A_norm @ H is the mean-aggregated neighbor feature."""
    scores = jax.random.uniform(key, (num_nodes, num_nodes))
    nbr_idx = jnp.argsort(scores, axis=1)[:, :num_neighbors]
    adj = jnp.zeros((num_nodes, num_nodes), jnp.float32)
    adj = adj.at[jnp.arange(num_nodes)[:, None], nbr_idx].set(1.0)
    deg = jnp.clip(adj.sum(axis=1, keepdims=True), 1.0, None)
    return adj / deg


if __name__ == "__main__":
    # Small sizes consistent with the module; kernels pad to lane-dense tiles.
    num_nodes = 16
    in_dim = 8
    hidden1_dim = 16
    hidden2_dim = 8
    num_neighbors = 4

    key = jax.random.PRNGKey(0)
    k_feat, k_adj, k1, k2, k3, k4, kb1, kb2 = jax.random.split(key, 8)

    feats = jax.random.normal(k_feat, (num_nodes, in_dim), jnp.float32)
    adj_norm = build_sampled_adjacency(k_adj, num_nodes, num_neighbors)

    def init_w(k, fan_in, fan_out):
        return (jax.random.normal(k, (fan_in, fan_out), jnp.float32)
                / jnp.sqrt(jnp.float32(fan_in)))

    ws1 = init_w(k1, in_dim, hidden1_dim)
    wn1 = init_w(k2, in_dim, hidden1_dim)
    b1 = 0.1 * jax.random.normal(kb1, (1, hidden1_dim), jnp.float32)
    ws2 = init_w(k3, hidden1_dim, hidden2_dim)
    wn2 = init_w(k4, hidden1_dim, hidden2_dim)
    b2 = 0.1 * jax.random.normal(kb2, (1, hidden2_dim), jnp.float32)

    # Pad + cast once (outside the per-call jit path).
    n, n_pad, p = pad_graphsage_params(adj_norm, feats, ws1, wn1, b1,
                                       ws2, wn2, b2)
    p = jax.tree_util.tree_map(jax.block_until_ready, p)

    out_pad = graphsage_forward_padded(p["adj"], p["x"], p["ws1"], p["wn1"],
                                       p["b1"], p["ws2"], p["wn2"], p["b2"])
    out_pad = jax.block_until_ready(out_pad)
    out = out_pad[:n, :n].astype(jnp.float32) if n != n_pad else \
        out_pad.astype(jnp.float32)

    ref = reference_forward(adj_norm, feats, ws1, wn1, b1, ws2, wn2, b2)
    assert out.shape == (num_nodes, num_nodes)
    # bf16 MXU inputs + bf16 output store -> compare against f32 reference with
    # a tolerance consistent with bf16 precision (sigmoid output in [0,1]).
    max_err = float(jnp.max(jnp.abs(out - ref)))
    assert max_err < 5e-2, f"max abs error {max_err}"

    print("KERNEL_OK")
</pallas_src>

<mosaic_0001>
module attributes {stable_mosaic.version = 11 : i64} {
  func.func @_decode_resident_kernel(%arg0: i32, %arg1: i32, %arg2: memref<256x128xbf16, #tpu.memory_space<vmem>>, %arg3: memref<256x256xbf16, #tpu.memory_space<vmem>>) attributes {dimension_semantics = [#tpu.dimension_semantics<parallel>, #tpu.dimension_semantics<parallel>], iteration_bounds = array<i64: 1, 1>, scalar_prefetch = 0 : i64, scratch_operands = 0 : i64, tpu.core_type = #tpu.core_type<tc>, window_params = [{pipeline_mode = #tpu.pipeline_mode<synchronous>, transform_indices = @transform_0, window_bounds = array<i64: 256, 128>}, {transform_indices = @transform_1, window_bounds = array<i64: 256, 256>}]} {
    %c256_i32 = arith.constant 256 : i32
    %0 = arith.muli %arg0, %c256_i32 : i32
    %1 = tpu.assume_multiple %0, 256 : i32
    %2 = arith.index_cast %1 : i32 to index
    %c0 = arith.constant 0 : index
    %3 = vector.load %arg2[%2, %c0] : memref<256x128xbf16, #tpu.memory_space<vmem>>, vector<256x128xbf16>
    %c256_i32_0 = arith.constant 256 : i32
    %4 = arith.muli %arg1, %c256_i32_0 : i32
    %5 = tpu.assume_multiple %4, 256 : i32
    %6 = arith.index_cast %5 : i32 to index
    %c0_1 = arith.constant 0 : index
    %7 = vector.load %arg2[%6, %c0_1] : memref<256x128xbf16, #tpu.memory_space<vmem>>, vector<256x128xbf16>
    %cst = arith.constant dense<0.000000e+00> : vector<256x256xf32>
    %8 = tpu.matmul %3, %7, %cst {dimension_numbers = #tpu.dot_dimension_numbers<[1], [1], [0], [0], [0, 0, 1, 0], [], []>} : vector<256x128xbf16>, vector<256x128xbf16>, vector<256x256xf32> -> vector<256x256xf32>
    %cst_2 = arith.constant 5.000000e-01 : f32
    %9 = vector.broadcast %cst_2 : f32 to vector<256x256xf32>
    %10 = arith.mulf %9, %8 : vector<256x256xf32>
    %11 = math.tanh %10 : vector<256x256xf32>
    %cst_3 = arith.constant 1.000000e+00 : f32
    %12 = vector.broadcast %cst_3 : f32 to vector<256x256xf32>
    %13 = arith.addf %11, %12 : vector<256x256xf32>
    %cst_4 = arith.constant 5.000000e-01 : f32
    %14 = vector.broadcast %cst_4 : f32 to vector<256x256xf32>
    %15 = arith.mulf %14, %13 : vector<256x256xf32>
    %16 = arith.truncf %15 : vector<256x256xf32> to vector<256x256xbf16>
    %c0_5 = arith.constant 0 : index
    %c0_6 = arith.constant 0 : index
    %17 = vector.load %arg3[%c0_5, %c0_6] : memref<256x256xbf16, #tpu.memory_space<vmem>>, vector<256x256xbf16>
    tpu.vector_store %arg3[%c0_5, %c0_6], %16 {strides = array<i32>} : memref<256x256xbf16, #tpu.memory_space<vmem>>, vector<256x256xbf16>,
    return
  }
  func.func @transform_0(%arg0: i32, %arg1: i32) -> (i32, i32) {
    %c0_i32 = arith.constant 0 : i32
    %c0_i32_0 = arith.constant 0 : i32
    %c0_i32_1 = arith.constant 0 : i32
    return %c0_i32, %c0_i32_0 : i32, i32
  }
  func.func @transform_1(%arg0: i32, %arg1: i32) -> (i32, i32) {
    %c0_i32 = arith.constant 0 : i32
    return %arg0, %arg1 : i32, i32
  }
}

module attributes {stable_mosaic.version = 11 : i64} {
  func.func @_sage_resident_kernel(%arg0: i32, %arg1: memref<256x256xbf16, #tpu.memory_space<vmem>>, %arg2: memref<256x128xbf16, #tpu.memory_space<vmem>>, %arg3: memref<128x128xbf16, #tpu.memory_space<vmem>>, %arg4: memref<128x128xbf16, #tpu.memory_space<vmem>>, %arg5: memref<8x128xf32, #tpu.memory_space<vmem>>, %arg6: memref<256x128xbf16, #tpu.memory_space<vmem>>) attributes {dimension_semantics = [#tpu.dimension_semantics<parallel>], iteration_bounds = array<i64: 1>, scalar_prefetch = 0 : i64, scratch_operands = 0 : i64, tpu.core_type = #tpu.core_type<tc>, window_params = [{transform_indices = @transform_0, window_bounds = array<i64: 256, 256>}, {pipeline_mode = #tpu.pipeline_mode<synchronous>, transform_indices = @transform_1, window_bounds = array<i64: 256, 128>}, {pipeline_mode = #tpu.pipeline_mode<synchronous>, transform_indices = @transform_2, window_bounds = array<i64: 128, 128>}, {pipeline_mode = #tpu.pipeline_mode<synchronous>, transform_indices = @transform_3, window_bounds = array<i64: 128, 128>}, {pipeline_mode = #tpu.pipeline_mode<synchronous>, transform_indices = @transform_4, window_bounds = array<i64: 8, 128>}, {transform_indices = @transform_5, window_bounds = array<i64: 256, 128>}]} {
    %c256_i32 = arith.constant 256 : i32
    %0 = arith.muli %arg0, %c256_i32 : i32
    %1 = tpu.assume_multiple %0, 256 : i32
    %2 = arith.index_cast %1 : i32 to index
    %c0 = arith.constant 0 : index
    %3 = vector.load %arg2[%2, %c0] : memref<256x128xbf16, #tpu.memory_space<vmem>>, vector<256x128xbf16>
    %c0_0 = arith.constant 0 : index
    %c0_1 = arith.constant 0 : index
    %4 = vector.load %arg1[%c0_0, %c0_1] : memref<256x256xbf16, #tpu.memory_space<vmem>>, vector<256x256xbf16>
    %c0_2 = arith.constant 0 : index
    %c0_3 = arith.constant 0 : index
    %5 = vector.load %arg2[%c0_2, %c0_3] : memref<256x128xbf16, #tpu.memory_space<vmem>>, vector<256x128xbf16>
    %cst = arith.constant dense<0.000000e+00> : vector<256x128xf32>
    %6 = tpu.matmul %4, %5, %cst {dimension_numbers = #tpu.dot_dimension_numbers<[1], [0], [0], [1], [0, 0, 1, 1], [], []>} : vector<256x256xbf16>, vector<256x128xbf16>, vector<256x128xf32> -> vector<256x128xf32>
    %c0_4 = arith.constant 0 : index
    %c0_5 = arith.constant 0 : index
    %7 = vector.load %arg3[%c0_4, %c0_5] : memref<128x128xbf16, #tpu.memory_space<vmem>>, vector<128x128xbf16>
    %cst_6 = arith.constant dense<0.000000e+00> : vector<256x128xf32>
    %8 = tpu.matmul %3, %7, %cst_6 {dimension_numbers = #tpu.dot_dimension_numbers<[1], [0], [0], [1], [0, 0, 1, 1], [], []>} : vector<256x128xbf16>, vector<128x128xbf16>, vector<256x128xf32> -> vector<256x128xf32>
    %9 = arith.truncf %6 : vector<256x128xf32> to vector<256x128xbf16>
    %c0_7 = arith.constant 0 : index
    %c0_8 = arith.constant 0 : index
    %10 = vector.load %arg4[%c0_7, %c0_8] : memref<128x128xbf16, #tpu.memory_space<vmem>>, vector<128x128xbf16>
    %cst_9 = arith.constant dense<0.000000e+00> : vector<256x128xf32>
    %11 = tpu.matmul %9, %10, %cst_9 {dimension_numbers = #tpu.dot_dimension_numbers<[1], [0], [0], [1], [0, 0, 1, 1], [], []>} : vector<256x128xbf16>, vector<128x128xbf16>, vector<256x128xf32> -> vector<256x128xf32>
    %12 = arith.addf %8, %11 : vector<256x128xf32>
    %c0_10 = arith.constant 0 : index
    %c0_11 = arith.constant 0 : index
    %13 = vector.load %arg5[%c0_10, %c0_11] : memref<8x128xf32, #tpu.memory_space<vmem>>, vector<1x128xf32>
    %14 = vector.broadcast %13 : vector<1x128xf32> to vector<256x128xf32>
    %15 = arith.addf %12, %14 : vector<256x128xf32>
    %cst_12 = arith.constant 0.000000e+00 : f32
    %16 = vector.broadcast %cst_12 : f32 to vector<256x128xf32>
    %17 = arith.maximumf %15, %16 : vector<256x128xf32>
    %18 = arith.truncf %17 : vector<256x128xf32> to vector<256x128xbf16>
    %c0_13 = arith.constant 0 : index
    %c0_14 = arith.constant 0 : index
    %19 = vector.load %arg6[%c0_13, %c0_14] : memref<256x128xbf16, #tpu.memory_space<vmem>>, vector<256x128xbf16>
    tpu.vector_store %arg6[%c0_13, %c0_14], %18 {strides = array<i32>} : memref<256x128xbf16, #tpu.memory_space<vmem>>, vector<256x128xbf16>,
    return
  }
  func.func @transform_0(%arg0: i32) -> (i32, i32) {
    %c0_i32 = arith.constant 0 : i32
    %c0_i32_0 = arith.constant 0 : i32
    return %arg0, %c0_i32 : i32, i32
  }
  func.func @transform_1(%arg0: i32) -> (i32, i32) {
    %c0_i32 = arith.constant 0 : i32
    %c0_i32_0 = arith.constant 0 : i32
    %c0_i32_1 = arith.constant 0 : i32
    return %c0_i32, %c0_i32_0 : i32, i32
  }
  func.func @transform_2(%arg0: i32) -> (i32, i32) {
    %c0_i32 = arith.constant 0 : i32
    %c0_i32_0 = arith.constant 0 : i32
    %c0_i32_1 = arith.constant 0 : i32
    return %c0_i32, %c0_i32_0 : i32, i32
  }
  func.func @transform_3(%arg0: i32) -> (i32, i32) {
    %c0_i32 = arith.constant 0 : i32
    %c0_i32_0 = arith.constant 0 : i32
    %c0_i32_1 = arith.constant 0 : i32
    return %c0_i32, %c0_i32_0 : i32, i32
  }
  func.func @transform_4(%arg0: i32) -> (i32, i32) {
    %c0_i32 = arith.constant 0 : i32
    %c0_i32_0 = arith.constant 0 : i32
    %c0_i32_1 = arith.constant 0 : i32
    return %c0_i32, %c0_i32_0 : i32, i32
  }
  func.func @transform_5(%arg0: i32) -> (i32, i32) {
    %c0_i32 = arith.constant 0 : i32
    %c0_i32_0 = arith.constant 0 : i32
    return %arg0, %c0_i32 : i32, i32
  }
}

module attributes {stable_mosaic.version = 11 : i64} {
  func.func @_sage_resident_kernel(%arg0: i32, %arg1: memref<256x256xbf16, #tpu.memory_space<vmem>>, %arg2: memref<256x128xbf16, #tpu.memory_space<vmem>>, %arg3: memref<128x128xbf16, #tpu.memory_space<vmem>>, %arg4: memref<128x128xbf16, #tpu.memory_space<vmem>>, %arg5: memref<8x128xf32, #tpu.memory_space<vmem>>, %arg6: memref<256x128xbf16, #tpu.memory_space<vmem>>) attributes {dimension_semantics = [#tpu.dimension_semantics<parallel>], iteration_bounds = array<i64: 1>, scalar_prefetch = 0 : i64, scratch_operands = 0 : i64, tpu.core_type = #tpu.core_type<tc>, window_params = [{transform_indices = @transform_0, window_bounds = array<i64: 256, 256>}, {pipeline_mode = #tpu.pipeline_mode<synchronous>, transform_indices = @transform_1, window_bounds = array<i64: 256, 128>}, {pipeline_mode = #tpu.pipeline_mode<synchronous>, transform_indices = @transform_2, window_bounds = array<i64: 128, 128>}, {pipeline_mode = #tpu.pipeline_mode<synchronous>, transform_indices = @transform_3, window_bounds = array<i64: 128, 128>}, {pipeline_mode = #tpu.pipeline_mode<synchronous>, transform_indices = @transform_4, window_bounds = array<i64: 8, 128>}, {transform_indices = @transform_5, window_bounds = array<i64: 256, 128>}]} {
    %c256_i32 = arith.constant 256 : i32
    %0 = arith.muli %arg0, %c256_i32 : i32
    %1 = tpu.assume_multiple %0, 256 : i32
    %2 = arith.index_cast %1 : i32 to index
    %c0 = arith.constant 0 : index
    %3 = vector.load %arg2[%2, %c0] : memref<256x128xbf16, #tpu.memory_space<vmem>>, vector<256x128xbf16>
    %c0_0 = arith.constant 0 : index
    %c0_1 = arith.constant 0 : index
    %4 = vector.load %arg1[%c0_0, %c0_1] : memref<256x256xbf16, #tpu.memory_space<vmem>>, vector<256x256xbf16>
    %c0_2 = arith.constant 0 : index
    %c0_3 = arith.constant 0 : index
    %5 = vector.load %arg2[%c0_2, %c0_3] : memref<256x128xbf16, #tpu.memory_space<vmem>>, vector<256x128xbf16>
    %cst = arith.constant dense<0.000000e+00> : vector<256x128xf32>
    %6 = tpu.matmul %4, %5, %cst {dimension_numbers = #tpu.dot_dimension_numbers<[1], [0], [0], [1], [0, 0, 1, 1], [], []>} : vector<256x256xbf16>, vector<256x128xbf16>, vector<256x128xf32> -> vector<256x128xf32>
    %c0_4 = arith.constant 0 : index
    %c0_5 = arith.constant 0 : index
    %7 = vector.load %arg3[%c0_4, %c0_5] : memref<128x128xbf16, #tpu.memory_space<vmem>>, vector<128x128xbf16>
    %cst_6 = arith.constant dense<0.000000e+00> : vector<256x128xf32>
    %8 = tpu.matmul %3, %7, %cst_6 {dimension_numbers = #tpu.dot_dimension_numbers<[1], [0], [0], [1], [0, 0, 1, 1], [], []>} : vector<256x128xbf16>, vector<128x128xbf16>, vector<256x128xf32> -> vector<256x128xf32>
    %9 = arith.truncf %6 : vector<256x128xf32> to vector<256x128xbf16>
    %c0_7 = arith.constant 0 : index
    %c0_8 = arith.constant 0 : index
    %10 = vector.load %arg4[%c0_7, %c0_8] : memref<128x128xbf16, #tpu.memory_space<vmem>>, vector<128x128xbf16>
    %cst_9 = arith.constant dense<0.000000e+00> : vector<256x128xf32>
    %11 = tpu.matmul %9, %10, %cst_9 {dimension_numbers = #tpu.dot_dimension_numbers<[1], [0], [0], [1], [0, 0, 1, 1], [], []>} : vector<256x128xbf16>, vector<128x128xbf16>, vector<256x128xf32> -> vector<256x128xf32>
    %12 = arith.addf %8, %11 : vector<256x128xf32>
    %c0_10 = arith.constant 0 : index
    %c0_11 = arith.constant 0 : index
    %13 = vector.load %arg5[%c0_10, %c0_11] : memref<8x128xf32, #tpu.memory_space<vmem>>, vector<1x128xf32>
    %14 = vector.broadcast %13 : vector<1x128xf32> to vector<256x128xf32>
    %15 = arith.addf %12, %14 : vector<256x128xf32>
    %cst_12 = arith.constant 0.000000e+00 : f32
    %16 = vector.broadcast %cst_12 : f32 to vector<256x128xf32>
    %17 = arith.maximumf %15, %16 : vector<256x128xf32>
    %18 = arith.truncf %17 : vector<256x128xf32> to vector<256x128xbf16>
    %c0_13 = arith.constant 0 : index
    %c0_14 = arith.constant 0 : index
    %19 = vector.load %arg6[%c0_13, %c0_14] : memref<256x128xbf16, #tpu.memory_space<vmem>>, vector<256x128xbf16>
    tpu.vector_store %arg6[%c0_13, %c0_14], %18 {strides = array<i32>} : memref<256x128xbf16, #tpu.memory_space<vmem>>, vector<256x128xbf16>,
    return
  }
  func.func @transform_0(%arg0: i32) -> (i32, i32) {
    %c0_i32 = arith.constant 0 : i32
    %c0_i32_0 = arith.constant 0 : i32
    return %arg0, %c0_i32 : i32, i32
  }
  func.func @transform_1(%arg0: i32) -> (i32, i32) {
    %c0_i32 = arith.constant 0 : i32
    %c0_i32_0 = arith.constant 0 : i32
    %c0_i32_1 = arith.constant 0 : i32
    return %c0_i32, %c0_i32_0 : i32, i32
  }
  func.func @transform_2(%arg0: i32) -> (i32, i32) {
    %c0_i32 = arith.constant 0 : i32
    %c0_i32_0 = arith.constant 0 : i32
    %c0_i32_1 = arith.constant 0 : i32
    return %c0_i32, %c0_i32_0 : i32, i32
  }
  func.func @transform_3(%arg0: i32) -> (i32, i32) {
    %c0_i32 = arith.constant 0 : i32
    %c0_i32_0 = arith.constant 0 : i32
    %c0_i32_1 = arith.constant 0 : i32
    return %c0_i32, %c0_i32_0 : i32, i32
  }
  func.func @transform_4(%arg0: i32) -> (i32, i32) {
    %c0_i32 = arith.constant 0 : i32
    %c0_i32_0 = arith.constant 0 : i32
    %c0_i32_1 = arith.constant 0 : i32
    return %c0_i32, %c0_i32_0 : i32, i32
  }
  func.func @transform_5(%arg0: i32) -> (i32, i32) {
    %c0_i32 = arith.constant 0 : i32
    %c0_i32_0 = arith.constant 0 : i32
    return %arg0, %c0_i32 : i32, i32
  }
}

</mosaic_0001>

<bundles_post_ra>
// kernel: graphsage_forward_padded.5
= control target key start
LH: loop header
LB: loop body
LE: loop exit
PB: predicated region body
PF: predicated region fallthrough
CT: control target
= control target key end

     0   :  { %s1240_s0 = inlined_call_operand.vmem [shape: bf16[256,128], index: 0, kind: input, shape index: {}]   ;;  %s1241_s1 = inlined_call_operand.hbm [shape: bf16[256,256], index: 1, kind: output, shape index: {}]  }
   0x1   :  { %v946_v0 = vld [vmem:[%s1240_s0 + $0x38] sm:$0xff] }
   0x2   :  { %v954_v1 = vld [vmem:[%s1240_s0 + $0x78] sm:$0xff]  ;;  %275 = vmatpush.bf16.xpose.msra.mxu0 %v946_v0  ;;  %955 = vmatpush.bf16.xpose.msra.mxu2 %v946_v0 }
   0x3   :  { %364 = vmatpush.bf16.xpose.msra.mxu1 %v954_v1  ;;  %963 = vmatpush.bf16.xpose.msra.mxu3 %v954_v1 }
   0x4   :  { %6 = vsyncpa [#allocation3], 0  ;;  %v945_v2 = vld [vmem:[%s1240_s0 + $0x30] sm:$0xff]  ;;  %v944_v4 = vld [vmem:[%s1240_s0 + $0x28] sm:$0xff]  ;;  %s779_s15 = sshll.u32 %s1241_s1, 4  ;;  %s1129_s16 = smov 128   ;;  %s780_s15 = int_to_ptr.hbm [resolvable:$true] %s779_s15 }
   0x5   :  { %v953_v3 = vld [vmem:[%s1240_s0 + $0x70] sm:$0xff]  ;;  %v952_v5 = vld [vmem:[%s1240_s0 + $0x68] sm:$0xff]  ;;  %v943_v6 = vld [vmem:[%s1240_s0 + $0x20] sm:$0xff]  ;;  %s1130_s17 = smov 8  }
   0x6   :  { %v951_v7 = vld [vmem:[%s1240_s0 + $0x60] sm:$0xff]  ;;  %v942_v8 = vld [vmem:[%s1240_s0 + $0x18] sm:$0xff]  ;;  %v941_v10 = vld [vmem:[%s1240_s0 + $0x10] sm:$0xff] }
   0x7   :  { %v950_v9 = vld [vmem:[%s1240_s0 + $0x58] sm:$0xff]  ;;  %v949_v11 = vld [vmem:[%s1240_s0 + $0x50] sm:$0xff]  ;;  %v940_v12 = vld [vmem:[%s1240_s0 + $0x8] sm:$0xff] }
   0x8   :  { %v948_v13 = vld [vmem:[%s1240_s0 + $0x48] sm:$0xff]  ;;  %v939_v14 = vld [vmem:[%s1240_s0] sm:$0xff]  ;;  %v925_v20 = vld [vmem:[%s1240_s0 + $0x10] sm:$0xff] }
   0x9   :  { %v947_v15 = vld [vmem:[%s1240_s0 + $0x40] sm:$0xff]  ;;  %v924_v18 = vld [vmem:[%s1240_s0 + $0x8] sm:$0xff]  ;;  %v933_v21 = vld [vmem:[%s1240_s0 + $0x50] sm:$0xff] }
   0xa   :  { %276 = vmatpush.bf16.xpose.msra.mxu0 %v945_v2  ;;  %956 = vmatpush.bf16.xpose.msra.mxu2 %v945_v2  ;;  %v923_v16 = vld [vmem:[%s1240_s0] sm:$0xff]  ;;  %v932_v19 = vld [vmem:[%s1240_s0 + $0x48] sm:$0xff]  ;;  %v926_v22 = vld [vmem:[%s1240_s0 + $0x18] sm:$0xff] }
   0xb   :  { %365 = vmatpush.bf16.xpose.msra.mxu1 %v953_v3  ;;  %964 = vmatpush.bf16.xpose.msra.mxu3 %v953_v3  ;;  %v931_v17 = vld [vmem:[%s1240_s0 + $0x40] sm:$0xff]  ;;  %v934_v23 = vld [vmem:[%s1240_s0 + $0x58] sm:$0xff]  ;;  %v928_v26 = vld [vmem:[%s1240_s0 + $0x28] sm:$0xff] }
   0xc   :  { %v927_v24 = vld [vmem:[%s1240_s0 + $0x20] sm:$0xff]  ;;  %v936_v27 = vld [vmem:[%s1240_s0 + $0x68] sm:$0xff]  ;;  %v929_v28 = vld [vmem:[%s1240_s0 + $0x30] sm:$0xff] }
   0xd   :  { %v935_v25 = vld [vmem:[%s1240_s0 + $0x60] sm:$0xff]  ;;  %v937_v29 = vld [vmem:[%s1240_s0 + $0x70] sm:$0xff]  ;;  %v930_v30 = vld [vmem:[%s1240_s0 + $0x38] sm:$0xff] }
   0xe   :  { %v938_v31 = vld [vmem:[%s1240_s0 + $0x78] sm:$0xff]  ;;  %s1128_s0 = smov [#allocation2]  }
   0xf   :  { %s777_s12 = sshll.u32 %s1128_s0, 4  ;;  %s778_s12 = int_to_ptr.vmem [resolvable:$true] %s777_s12 }
  0x12   :  { %277 = vmatpush.bf16.xpose.msra.mxu0 %v944_v4  ;;  %957 = vmatpush.bf16.xpose.msra.mxu2 %v944_v4 }
  0x13   :  { %366 = vmatpush.bf16.xpose.msra.mxu1 %v952_v5  ;;  %965 = vmatpush.bf16.xpose.msra.mxu3 %v952_v5 }
  0x1a   :  { %278 = vmatpush.bf16.xpose.msra.mxu0 %v943_v6  ;;  %958 = vmatpush.bf16.xpose.msra.mxu2 %v943_v6 }
  0x1b   :  { %367 = vmatpush.bf16.xpose.msra.mxu1 %v951_v7  ;;  %966 = vmatpush.bf16.xpose.msra.mxu3 %v951_v7 }
  0x22   :  { %279 = vmatpush.bf16.xpose.msra.mxu0 %v942_v8  ;;  %959 = vmatpush.bf16.xpose.msra.mxu2 %v942_v8 }
  0x23   :  { %368 = vmatpush.bf16.xpose.msra.mxu1 %v950_v9  ;;  %967 = vmatpush.bf16.xpose.msra.mxu3 %v950_v9 }
  0x2a   :  { %280 = vmatpush.bf16.xpose.msra.mxu0 %v941_v10  ;;  %960 = vmatpush.bf16.xpose.msra.mxu2 %v941_v10 }
  0x2b   :  { %369 = vmatpush.bf16.xpose.msra.mxu1 %v949_v11  ;;  %968 = vmatpush.bf16.xpose.msra.mxu3 %v949_v11 }
  0x32   :  { %281 = vmatpush.bf16.xpose.msra.mxu0 %v940_v12  ;;  %961 = vmatpush.bf16.xpose.msra.mxu2 %v940_v12 }
  0x33   :  { %370 = vmatpush.bf16.xpose.msra.mxu1 %v948_v13  ;;  %969 = vmatpush.bf16.xpose.msra.mxu3 %v948_v13 }
  0x3a   :  { %282 = vmatpush.bf16.xpose.msra.mxu0 %v939_v14  ;;  %962 = vmatpush.bf16.xpose.msra.mxu2 %v939_v14 }
  0x3b   :  { %371 = vmatpush.bf16.xpose.msra.mxu1 %v947_v15  ;;  %970 = vmatpush.bf16.xpose.msra.mxu3 %v947_v15 }
  0x41   :  { %283 = vmatmul.bf16.vlgmr.msra.gmra.mxu0 %v923_v16  ;;  %323 = vmatmul.bf16.vlgmr.msra.gmra.mxu2 %v931_v17 }
  0x42   :  { %372 = vmatmul.bf16.vlgmr.msra.gmra.mxu1 %v923_v16  ;;  %412 = vmatmul.bf16.vlgmr.msra.gmra.mxu3 %v931_v17 }
  0x51   :  { %288 = vmatmul.bf16.gmra.mxu0 %v924_v18  ;;  %328 = vmatmul.bf16.gmra.mxu2 %v932_v19 }
  0x52   :  { %377 = vmatmul.bf16.gmra.mxu1 %v924_v18  ;;  %417 = vmatmul.bf16.gmra.mxu3 %v932_v19 }
  0x61   :  { %293 = vmatmul.bf16.gmra.mxu0 %v925_v20  ;;  %333 = vmatmul.bf16.gmra.mxu2 %v933_v21 }
  0x62   :  { %382 = vmatmul.bf16.gmra.mxu1 %v925_v20  ;;  %422 = vmatmul.bf16.gmra.mxu3 %v933_v21 }
  0x71   :  { %298 = vmatmul.bf16.gmra.mxu0 %v926_v22  ;;  %338 = vmatmul.bf16.gmra.mxu2 %v934_v23 }
  0x72   :  { %387 = vmatmul.bf16.gmra.mxu1 %v926_v22  ;;  %427 = vmatmul.bf16.gmra.mxu3 %v934_v23 }
  0x81   :  { %303 = vmatmul.bf16.gmra.mxu0 %v927_v24  ;;  %343 = vmatmul.bf16.gmra.mxu2 %v935_v25 }
  0x82   :  { %392 = vmatmul.bf16.gmra.mxu1 %v927_v24  ;;  %432 = vmatmul.bf16.gmra.mxu3 %v935_v25 }
  0x91   :  { %308 = vmatmul.bf16.gmra.mxu0 %v928_v26  ;;  %348 = vmatmul.bf16.gmra.mxu2 %v936_v27 }
  0x92   :  { %397 = vmatmul.bf16.gmra.mxu1 %v928_v26  ;;  %437 = vmatmul.bf16.gmra.mxu3 %v936_v27 }
  0xa1   :  { %313 = vmatmul.bf16.gmra.mxu0 %v929_v28  ;;  %353 = vmatmul.bf16.gmra.mxu2 %v937_v29 }
  0xa2   :  { %402 = vmatmul.bf16.gmra.mxu1 %v929_v28  ;;  %442 = vmatmul.bf16.gmra.mxu3 %v937_v29 }
  0xb1   :  { %318 = vmatmul.bf16.gmra.mxu0 %v930_v30  ;;  %358 = vmatmul.bf16.gmra.mxu2 %v938_v31 }
  0xb2   :  { %407 = vmatmul.bf16.gmra.mxu1 %v930_v30  ;;  %447 = vmatmul.bf16.gmra.mxu3 %v938_v31 }
  0xbe   :  { %v284_v32 = vpop.f32.mrf.mxu0 }
  0xbf   :  { %v453_v33 = vmul.f32 0.5, %v284_v32  ;;  %v373_v34 = vpop.f32.mrf.mxu1 }
  0xc0   :  { %v454_v35 = vmul.f32 0.5, %v373_v34 }
  0xc1   :  { %974 = vtanh.f32 %v453_v33 }
  0xc2   :  { %976 = vtanh.f32 %v454_v35 }
  0xc4   :  { %v324_v36 = vpop.f32.mrf.mxu2 }
  0xc5   :  { %v485_v37 = vmul.f32 0.5, %v324_v36  ;;  %v413_v38 = vpop.f32.mrf.mxu3 }
  0xc6   :  { %v486_v39 = vmul.f32 0.5, %v413_v38  ;;  %v286_v40 = vpop.f32.mrf.mxu0 }
  0xc7   :  { %v975_v41 = vpop.eup %974  ;;  %978 = vtanh.f32 %v485_v37  ;;  %v455_v42 = vmul.f32 0.5, %v286_v40  ;;  %v375_v43 = vpop.f32.mrf.mxu1 }
  0xc8   :  { %v977_v44 = vpop.eup %976  ;;  %v581_v45 = vadd.f32 1.0, %v975_v41  ;;  %980 = vtanh.f32 %v486_v39  ;;  %v456_v46 = vmul.f32 0.5, %v375_v43 }
  0xc9   :  { %v582_v47 = vadd.f32 1.0, %v977_v44  ;;  %982 = vtanh.f32 %v455_v42 }
  0xca   :  { %v645_v48 = vmul.f32 0.5, %v581_v45  ;;  %984 = vtanh.f32 %v456_v46 }
  0xcb   :  { %v646_v49 = vmul.f32 0.5, %v582_v47 }
  0xcc   :  { %v326_v50 = vpop.f32.mrf.mxu2 }
  0xcd   :  { %v979_v51 = vpop.eup %978  ;;  %v709_v52 = vpack.c.bf16 %v646_v49, %v645_v48  ;;  %v487_v53 = vmul.f32 0.5, %v326_v50  ;;  %v415_v54 = vpop.f32.mrf.mxu3 }
  0xce   :  { %v981_v55 = vpop.eup %980  ;;  %v613_v56 = vadd.f32 1.0, %v979_v51  ;;  %v488_v57 = vmul.f32 0.5, %v415_v54  ;;  %v289_v58 = vpop.f32.mrf.mxu0 }
  0xcf   :  { %v983_v59 = vpop.eup %982  ;;  %741 = vst [vmem:[#allocation2] sm:$0xff] %v709_v52  ;;  %v614_v60 = vadd.f32 1.0, %v981_v55  ;;  %986 = vtanh.f32 %v487_v53  ;;  %v457_v61 = vmul.f32 0.5, %v289_v58  ;;  %v378_v62 = vpop.f32.mrf.mxu1 }
  0xd0   :  { %v985_v63 = vpop.eup %984  ;;  %v677_v0 = vmul.f32 0.5, %v613_v56  ;;  %v583_v1 = vadd.f32 1.0, %v983_v59  ;;  %988 = vtanh.f32 %v488_v57  ;;  %v458_v2 = vmul.f32 0.5, %v378_v62 }
  0xd1   :  { %v678_v3 = vmul.f32 0.5, %v614_v60  ;;  %v584_v4 = vadd.f32 1.0, %v985_v63  ;;  %990 = vtanh.f32 %v457_v61 }
  0xd2   :  { %v647_v5 = vmul.f32 0.5, %v583_v1  ;;  %992 = vtanh.f32 %v458_v2 }
  0xd3   :  { %v725_v6 = vpack.c.bf16 %v678_v3, %v677_v0  ;;  %v648_v7 = vmul.f32 0.5, %v584_v4 }
  0xd4   :  { %v329_v8 = vpop.f32.mrf.mxu2 }
  0xd5   :  { %v987_v9 = vpop.eup %986  ;;  %757 = vst [vmem:[#allocation2 + $0x80] sm:$0xff] %v725_v6  ;;  %v710_v10 = vpack.c.bf16 %v648_v7, %v647_v5  ;;  %v489_v11 = vmul.f32 0.5, %v329_v8  ;;  %v418_v12 = vpop.f32.mrf.mxu3 }
  0xd6   :  { %v989_v13 = vpop.eup %988  ;;  %v615_v14 = vadd.f32 1.0, %v987_v9  ;;  %v490_v15 = vmul.f32 0.5, %v418_v12  ;;  %v291_v16 = vpop.f32.mrf.mxu0 }
  0xd7   :  { %v991_v17 = vpop.eup %990  ;;  %742 = vst [vmem:[#allocation2 + $0x8] sm:$0xff] %v710_v10  ;;  %v616_v18 = vadd.f32 1.0, %v989_v13  ;;  %994 = vtanh.f32 %v489_v11  ;;  %v459_v19 = vmul.f32 0.5, %v291_v16  ;;  %v380_v20 = vpop.f32.mrf.mxu1 }
  0xd8   :  { %v993_v21 = vpop.eup %992  ;;  %v679_v22 = vmul.f32 0.5, %v615_v14  ;;  %v585_v23 = vadd.f32 1.0, %v991_v17  ;;  %996 = vtanh.f32 %v490_v15  ;;  %v460_v24 = vmul.f32 0.5, %v380_v20 }
  0xd9   :  { %v680_v25 = vmul.f32 0.5, %v616_v18  ;;  %v586_v26 = vadd.f32 1.0, %v993_v21  ;;  %998 = vtanh.f32 %v459_v19 }
  0xda   :  { %v649_v27 = vmul.f32 0.5, %v585_v23  ;;  %1000 = vtanh.f32 %v460_v24 }
  0xdb   :  { %v726_v28 = vpack.c.bf16 %v680_v25, %v679_v22  ;;  %v650_v29 = vmul.f32 0.5, %v586_v26 }
  0xdc   :  { %v331_v30 = vpop.f32.mrf.mxu2 }
  0xdd   :  { %v995_v31 = vpop.eup %994  ;;  %758 = vst [vmem:[#allocation2 + $0x88] sm:$0xff] %v726_v28  ;;  %v711_v32 = vpack.c.bf16 %v650_v29, %v649_v27  ;;  %v491_v33 = vmul.f32 0.5, %v331_v30  ;;  %v420_v34 = vpop.f32.mrf.mxu3 }
  0xde   :  { %v997_v35 = vpop.eup %996  ;;  %v617_v36 = vadd.f32 1.0, %v995_v31  ;;  %v492_v37 = vmul.f32 0.5, %v420_v34  ;;  %v294_v38 = vpop.f32.mrf.mxu0 }
  0xdf   :  { %v999_v39 = vpop.eup %998  ;;  %743 = vst [vmem:[#allocation2 + $0x10] sm:$0xff] %v711_v32  ;;  %v618_v40 = vadd.f32 1.0, %v997_v35  ;;  %1002 = vtanh.f32 %v491_v33  ;;  %v461_v41 = vmul.f32 0.5, %v294_v38  ;;  %v383_v42 = vpop.f32.mrf.mxu1 }
  0xe0   :  { %v1001_v43 = vpop.eup %1000  ;;  %v681_v44 = vmul.f32 0.5, %v617_v36  ;;  %v587_v45 = vadd.f32 1.0, %v999_v39  ;;  %1004 = vtanh.f32 %v492_v37  ;;  %v462_v46 = vmul.f32 0.5, %v383_v42 }
  0xe1   :  { %v682_v47 = vmul.f32 0.5, %v618_v40  ;;  %v588_v48 = vadd.f32 1.0, %v1001_v43  ;;  %1006 = vtanh.f32 %v461_v41 }
  0xe2   :  { %v651_v49 = vmul.f32 0.5, %v587_v45  ;;  %1008 = vtanh.f32 %v462_v46 }
  0xe3   :  { %v727_v50 = vpack.c.bf16 %v682_v47, %v681_v44  ;;  %v652_v51 = vmul.f32 0.5, %v588_v48 }
  0xe4   :  { %v334_v52 = vpop.f32.mrf.mxu2 }
  0xe5   :  { %v1003_v53 = vpop.eup %1002  ;;  %759 = vst [vmem:[#allocation2 + $0x90] sm:$0xff] %v727_v50  ;;  %v712_v54 = vpack.c.bf16 %v652_v51, %v651_v49  ;;  %v493_v55 = vmul.f32 0.5, %v334_v52  ;;  %v423_v56 = vpop.f32.mrf.mxu3 }
  0xe6   :  { %v1005_v57 = vpop.eup %1004  ;;  %v619_v58 = vadd.f32 1.0, %v1003_v53  ;;  %v494_v59 = vmul.f32 0.5, %v423_v56  ;;  %v296_v60 = vpop.f32.mrf.mxu0 }
  0xe7   :  { %v1007_v61 = vpop.eup %1006  ;;  %744 = vst [vmem:[#allocation2 + $0x18] sm:$0xff] %v712_v54  ;;  %v620_v62 = vadd.f32 1.0, %v1005_v57  ;;  %1010 = vtanh.f32 %v493_v55  ;;  %v463_v63 = vmul.f32 0.5, %v296_v60  ;;  %v385_v0 = vpop.f32.mrf.mxu1 }
  0xe8   :  { %v1009_v1 = vpop.eup %1008  ;;  %v683_v2 = vmul.f32 0.5, %v619_v58  ;;  %v589_v3 = vadd.f32 1.0, %v1007_v61  ;;  %1012 = vtanh.f32 %v494_v59  ;;  %v464_v4 = vmul.f32 0.5, %v385_v0 }
  0xe9   :  { %v684_v5 = vmul.f32 0.5, %v620_v62  ;;  %v590_v6 = vadd.f32 1.0, %v1009_v1  ;;  %1014 = vtanh.f32 %v463_v63 }
  0xea   :  { %v653_v7 = vmul.f32 0.5, %v589_v3  ;;  %1016 = vtanh.f32 %v464_v4 }
  0xeb   :  { %v728_v8 = vpack.c.bf16 %v684_v5, %v683_v2  ;;  %v654_v9 = vmul.f32 0.5, %v590_v6 }
  0xec   :  { %v336_v10 = vpop.f32.mrf.mxu2 }
  0xed   :  { %v1011_v11 = vpop.eup %1010  ;;  %760 = vst [vmem:[#allocation2 + $0x98] sm:$0xff] %v728_v8  ;;  %v713_v12 = vpack.c.bf16 %v654_v9, %v653_v7  ;;  %v495_v13 = vmul.f32 0.5, %v336_v10  ;;  %v425_v14 = vpop.f32.mrf.mxu3 }
  0xee   :  { %v1013_v15 = vpop.eup %1012  ;;  %v621_v16 = vadd.f32 1.0, %v1011_v11  ;;  %v496_v17 = vmul.f32 0.5, %v425_v14  ;;  %v299_v18 = vpop.f32.mrf.mxu0 }
  0xef   :  { %v1015_v19 = vpop.eup %1014  ;;  %745 = vst [vmem:[#allocation2 + $0x20] sm:$0xff] %v713_v12  ;;  %v622_v20 = vadd.f32 1.0, %v1013_v15  ;;  %1018 = vtanh.f32 %v495_v13  ;;  %v465_v21 = vmul.f32 0.5, %v299_v18  ;;  %v388_v22 = vpop.f32.mrf.mxu1 }
  0xf0   :  { %v1017_v23 = vpop.eup %1016  ;;  %v685_v24 = vmul.f32 0.5, %v621_v16  ;;  %v591_v25 = vadd.f32 1.0, %v1015_v19  ;;  %1020 = vtanh.f32 %v496_v17  ;;  %v466_v26 = vmul.f32 0.5, %v388_v22 }
  0xf1   :  { %v686_v27 = vmul.f32 0.5, %v622_v20  ;;  %v592_v28 = vadd.f32 1.0, %v1017_v23  ;;  %1022 = vtanh.f32 %v465_v21 }
  0xf2   :  { %v655_v29 = vmul.f32 0.5, %v591_v25  ;;  %1024 = vtanh.f32 %v466_v26 }
  0xf3   :  { %v729_v30 = vpack.c.bf16 %v686_v27, %v685_v24  ;;  %v656_v31 = vmul.f32 0.5, %v592_v28 }
  0xf4   :  { %v339_v32 = vpop.f32.mrf.mxu2 }
  0xf5   :  { %v1019_v33 = vpop.eup %1018  ;;  %761 = vst [vmem:[#allocation2 + $0xa0] sm:$0xff] %v729_v30  ;;  %v714_v34 = vpack.c.bf16 %v656_v31, %v655_v29  ;;  %v497_v35 = vmul.f32 0.5, %v339_v32  ;;  %v428_v36 = vpop.f32.mrf.mxu3 }
  0xf6   :  { %v1021_v37 = vpop.eup %1020  ;;  %v623_v38 = vadd.f32 1.0, %v1019_v33  ;;  %v498_v39 = vmul.f32 0.5, %v428_v36  ;;  %v301_v40 = vpop.f32.mrf.mxu0 }
  0xf7   :  { %v1023_v41 = vpop.eup %1022  ;;  %746 = vst [vmem:[#allocation2 + $0x28] sm:$0xff] %v714_v34  ;;  %v624_v42 = vadd.f32 1.0, %v1021_v37  ;;  %1026 = vtanh.f32 %v497_v35  ;;  %v467_v43 = vmul.f32 0.5, %v301_v40  ;;  %v390_v44 = vpop.f32.mrf.mxu1 }
  0xf8   :  { %v1025_v45 = vpop.eup %1024  ;;  %v687_v46 = vmul.f32 0.5, %v623_v38  ;;  %v593_v47 = vadd.f32 1.0, %v1023_v41  ;;  %1028 = vtanh.f32 %v498_v39  ;;  %v468_v48 = vmul.f32 0.5, %v390_v44 }
  0xf9   :  { %v688_v49 = vmul.f32 0.5, %v624_v42  ;;  %v594_v50 = vadd.f32 1.0, %v1025_v45  ;;  %1030 = vtanh.f32 %v467_v43 }
  0xfa   :  { %v657_v51 = vmul.f32 0.5, %v593_v47  ;;  %1032 = vtanh.f32 %v468_v48 }
  0xfb   :  { %v730_v52 = vpack.c.bf16 %v688_v49, %v687_v46  ;;  %v658_v53 = vmul.f32 0.5, %v594_v50 }
  0xfc   :  { %v341_v54 = vpop.f32.mrf.mxu2 }
  0xfd   :  { %v1027_v55 = vpop.eup %1026  ;;  %762 = vst [vmem:[#allocation2 + $0xa8] sm:$0xff] %v730_v52  ;;  %v715_v56 = vpack.c.bf16 %v658_v53, %v657_v51  ;;  %v499_v57 = vmul.f32 0.5, %v341_v54  ;;  %v430_v58 = vpop.f32.mrf.mxu3 }
  0xfe   :  { %v1029_v59 = vpop.eup %1028  ;;  %v625_v60 = vadd.f32 1.0, %v1027_v55  ;;  %v500_v61 = vmul.f32 0.5, %v430_v58  ;;  %v304_v62 = vpop.f32.mrf.mxu0 }
  0xff   :  { %v1031_v63 = vpop.eup %1030  ;;  %747 = vst [vmem:[#allocation2 + $0x30] sm:$0xff] %v715_v56  ;;  %v626_v0 = vadd.f32 1.0, %v1029_v59  ;;  %1034 = vtanh.f32 %v499_v57  ;;  %v469_v1 = vmul.f32 0.5, %v304_v62  ;;  %v393_v2 = vpop.f32.mrf.mxu1 }
 0x100   :  { %v1033_v3 = vpop.eup %1032  ;;  %v689_v4 = vmul.f32 0.5, %v625_v60  ;;  %v595_v5 = vadd.f32 1.0, %v1031_v63  ;;  %1036 = vtanh.f32 %v500_v61  ;;  %v470_v6 = vmul.f32 0.5, %v393_v2 }
 0x101   :  { %v690_v7 = vmul.f32 0.5, %v626_v0  ;;  %v596_v8 = vadd.f32 1.0, %v1033_v3  ;;  %1038 = vtanh.f32 %v469_v1 }
 0x102   :  { %v659_v9 = vmul.f32 0.5, %v595_v5  ;;  %1040 = vtanh.f32 %v470_v6 }
 0x103   :  { %v731_v10 = vpack.c.bf16 %v690_v7, %v689_v4  ;;  %v660_v11 = vmul.f32 0.5, %v596_v8 }
 0x104   :  { %v344_v12 = vpop.f32.mrf.mxu2 }
 0x105   :  { %v1035_v13 = vpop.eup %1034  ;;  %763 = vst [vmem:[#allocation2 + $0xb0] sm:$0xff] %v731_v10  ;;  %v716_v14 = vpack.c.bf16 %v660_v11, %v659_v9  ;;  %v501_v15 = vmul.f32 0.5, %v344_v12  ;;  %v433_v16 = vpop.f32.mrf.mxu3 }
 0x106   :  { %v1037_v17 = vpop.eup %1036  ;;  %v627_v18 = vadd.f32 1.0, %v1035_v13  ;;  %v502_v19 = vmul.f32 0.5, %v433_v16  ;;  %v306_v20 = vpop.f32.mrf.mxu0 }
 0x107   :  { %v1039_v21 = vpop.eup %1038  ;;  %748 = vst [vmem:[#allocation2 + $0x38] sm:$0xff] %v716_v14  ;;  %v628_v22 = vadd.f32 1.0, %v1037_v17  ;;  %1042 = vtanh.f32 %v501_v15  ;;  %v471_v23 = vmul.f32 0.5, %v306_v20  ;;  %v395_v24 = vpop.f32.mrf.mxu1 }
 0x108   :  { %v1041_v25 = vpop.eup %1040  ;;  %v691_v26 = vmul.f32 0.5, %v627_v18  ;;  %v597_v27 = vadd.f32 1.0, %v1039_v21  ;;  %1044 = vtanh.f32 %v502_v19  ;;  %v472_v28 = vmul.f32 0.5, %v395_v24 }
 0x109   :  { %v692_v29 = vmul.f32 0.5, %v628_v22  ;;  %v598_v30 = vadd.f32 1.0, %v1041_v25  ;;  %1046 = vtanh.f32 %v471_v23 }
 0x10a   :  { %v661_v31 = vmul.f32 0.5, %v597_v27  ;;  %1048 = vtanh.f32 %v472_v28 }
 0x10b   :  { %v732_v32 = vpack.c.bf16 %v692_v29, %v691_v26  ;;  %v662_v33 = vmul.f32 0.5, %v598_v30 }
 0x10c   :  { %v346_v34 = vpop.f32.mrf.mxu2 }
 0x10d   :  { %v1043_v35 = vpop.eup %1042  ;;  %764 = vst [vmem:[#allocation2 + $0xb8] sm:$0xff] %v732_v32  ;;  %v717_v36 = vpack.c.bf16 %v662_v33, %v661_v31  ;;  %v503_v37 = vmul.f32 0.5, %v346_v34  ;;  %v435_v38 = vpop.f32.mrf.mxu3 }
 0x10e   :  { %v1045_v39 = vpop.eup %1044  ;;  %v629_v40 = vadd.f32 1.0, %v1043_v35  ;;  %v504_v41 = vmul.f32 0.5, %v435_v38  ;;  %v309_v42 = vpop.f32.mrf.mxu0 }
 0x10f   :  { %v1047_v43 = vpop.eup %1046  ;;  %749 = vst [vmem:[#allocation2 + $0x40] sm:$0xff] %v717_v36  ;;  %v630_v44 = vadd.f32 1.0, %v1045_v39  ;;  %1050 = vtanh.f32 %v503_v37  ;;  %v473_v45 = vmul.f32 0.5, %v309_v42  ;;  %v398_v46 = vpop.f32.mrf.mxu1 }
 0x110   :  { %v1049_v47 = vpop.eup %1048  ;;  %v693_v48 = vmul.f32 0.5, %v629_v40  ;;  %v599_v49 = vadd.f32 1.0, %v1047_v43  ;;  %1052 = vtanh.f32 %v504_v41  ;;  %v474_v50 = vmul.f32 0.5, %v398_v46 }
 0x111   :  { %v694_v51 = vmul.f32 0.5, %v630_v44  ;;  %v600_v52 = vadd.f32 1.0, %v1049_v47  ;;  %1054 = vtanh.f32 %v473_v45 }
 0x112   :  { %v663_v53 = vmul.f32 0.5, %v599_v49  ;;  %1056 = vtanh.f32 %v474_v50 }
 0x113   :  { %v733_v54 = vpack.c.bf16 %v694_v51, %v693_v48  ;;  %v664_v55 = vmul.f32 0.5, %v600_v52 }
 0x114   :  { %v349_v56 = vpop.f32.mrf.mxu2 }
 0x115   :  { %v1051_v57 = vpop.eup %1050  ;;  %765 = vst [vmem:[#allocation2 + $0xc0] sm:$0xff] %v733_v54  ;;  %v718_v58 = vpack.c.bf16 %v664_v55, %v663_v53  ;;  %v505_v59 = vmul.f32 0.5, %v349_v56  ;;  %v438_v60 = vpop.f32.mrf.mxu3 }
 0x116   :  { %v1053_v61 = vpop.eup %1052  ;;  %v631_v62 = vadd.f32 1.0, %v1051_v57  ;;  %v506_v63 = vmul.f32 0.5, %v438_v60  ;;  %v311_v0 = vpop.f32.mrf.mxu0 }
 0x117   :  { %v1055_v1 = vpop.eup %1054  ;;  %750 = vst [vmem:[#allocation2 + $0x48] sm:$0xff] %v718_v58  ;;  %v632_v2 = vadd.f32 1.0, %v1053_v61  ;;  %1058 = vtanh.f32 %v505_v59  ;;  %v475_v3 = vmul.f32 0.5, %v311_v0  ;;  %v400_v4 = vpop.f32.mrf.mxu1 }
 0x118   :  { %v1057_v5 = vpop.eup %1056  ;;  %v695_v6 = vmul.f32 0.5, %v631_v62  ;;  %v601_v7 = vadd.f32 1.0, %v1055_v1  ;;  %1060 = vtanh.f32 %v506_v63  ;;  %v476_v8 = vmul.f32 0.5, %v400_v4 }
 0x119   :  { %v696_v9 = vmul.f32 0.5, %v632_v2  ;;  %v602_v10 = vadd.f32 1.0, %v1057_v5  ;;  %1062 = vtanh.f32 %v475_v3 }
 0x11a   :  { %v665_v11 = vmul.f32 0.5, %v601_v7  ;;  %1064 = vtanh.f32 %v476_v8 }
 0x11b   :  { %v734_v12 = vpack.c.bf16 %v696_v9, %v695_v6  ;;  %v666_v13 = vmul.f32 0.5, %v602_v10 }
 0x11c   :  { %v351_v14 = vpop.f32.mrf.mxu2 }
 0x11d   :  { %v1059_v15 = vpop.eup %1058  ;;  %766 = vst [vmem:[#allocation2 + $0xc8] sm:$0xff] %v734_v12  ;;  %v719_v16 = vpack.c.bf16 %v666_v13, %v665_v11  ;;  %v507_v17 = vmul.f32 0.5, %v351_v14  ;;  %v440_v18 = vpop.f32.mrf.mxu3 }
 0x11e   :  { %v1061_v19 = vpop.eup %1060  ;;  %v633_v20 = vadd.f32 1.0, %v1059_v15  ;;  %v508_v21 = vmul.f32 0.5, %v440_v18  ;;  %v314_v22 = vpop.f32.mrf.mxu0 }
 0x11f   :  { %v1063_v23 = vpop.eup %1062  ;;  %751 = vst [vmem:[#allocation2 + $0x50] sm:$0xff] %v719_v16  ;;  %v634_v24 = vadd.f32 1.0, %v1061_v19  ;;  %1066 = vtanh.f32 %v507_v17  ;;  %v477_v25 = vmul.f32 0.5, %v314_v22  ;;  %v403_v26 = vpop.f32.mrf.mxu1 }
 0x120   :  { %v1065_v27 = vpop.eup %1064  ;;  %v697_v28 = vmul.f32 0.5, %v633_v20  ;;  %v603_v29 = vadd.f32 1.0, %v1063_v23  ;;  %1068 = vtanh.f32 %v508_v21  ;;  %v478_v30 = vmul.f32 0.5, %v403_v26 }
 0x121   :  { %v698_v31 = vmul.f32 0.5, %v634_v24  ;;  %v604_v32 = vadd.f32 1.0, %v1065_v27  ;;  %1070 = vtanh.f32 %v477_v25 }
 0x122   :  { %v667_v33 = vmul.f32 0.5, %v603_v29  ;;  %1072 = vtanh.f32 %v478_v30 }
 0x123   :  { %v735_v34 = vpack.c.bf16 %v698_v31, %v697_v28  ;;  %v668_v35 = vmul.f32 0.5, %v604_v32 }
 0x124   :  { %v354_v36 = vpop.f32.mrf.mxu2 }
 0x125   :  { %v1067_v37 = vpop.eup %1066  ;;  %767 = vst [vmem:[#allocation2 + $0xd0] sm:$0xff] %v735_v34  ;;  %v720_v38 = vpack.c.bf16 %v668_v35, %v667_v33  ;;  %v509_v39 = vmul.f32 0.5, %v354_v36  ;;  %v443_v40 = vpop.f32.mrf.mxu3 }
 0x126   :  { %v1069_v41 = vpop.eup %1068  ;;  %v635_v42 = vadd.f32 1.0, %v1067_v37  ;;  %v510_v43 = vmul.f32 0.5, %v443_v40  ;;  %v316_v44 = vpop.f32.mrf.mxu0 }
 0x127   :  { %v1071_v45 = vpop.eup %1070  ;;  %752 = vst [vmem:[#allocation2 + $0x58] sm:$0xff] %v720_v38  ;;  %v636_v46 = vadd.f32 1.0, %v1069_v41  ;;  %1074 = vtanh.f32 %v509_v39  ;;  %v479_v47 = vmul.f32 0.5, %v316_v44  ;;  %v405_v48 = vpop.f32.mrf.mxu1 }
 0x128   :  { %v1073_v49 = vpop.eup %1072  ;;  %v699_v50 = vmul.f32 0.5, %v635_v42  ;;  %v605_v51 = vadd.f32 1.0, %v1071_v45  ;;  %1076 = vtanh.f32 %v510_v43  ;;  %v480_v52 = vmul.f32 0.5, %v405_v48 }
 0x129   :  { %v700_v53 = vmul.f32 0.5, %v636_v46  ;;  %v606_v54 = vadd.f32 1.0, %v1073_v49  ;;  %1078 = vtanh.f32 %v479_v47 }
 0x12a   :  { %v669_v55 = vmul.f32 0.5, %v605_v51  ;;  %1080 = vtanh.f32 %v480_v52 }
 0x12b   :  { %v736_v56 = vpack.c.bf16 %v700_v53, %v699_v50  ;;  %v670_v57 = vmul.f32 0.5, %v606_v54 }
 0x12c   :  { %v356_v58 = vpop.f32.mrf.mxu2 }
 0x12d   :  { %v1075_v59 = vpop.eup %1074  ;;  %768 = vst [vmem:[#allocation2 + $0xd8] sm:$0xff] %v736_v56  ;;  %v721_v60 = vpack.c.bf16 %v670_v57, %v669_v55  ;;  %v511_v61 = vmul.f32 0.5, %v356_v58  ;;  %v445_v62 = vpop.f32.mrf.mxu3 }
 0x12e   :  { %v1077_v63 = vpop.eup %1076  ;;  %v637_v0 = vadd.f32 1.0, %v1075_v59  ;;  %v512_v1 = vmul.f32 0.5, %v445_v62  ;;  %v319_v2 = vpop.f32.mrf.mxu0 }
 0x12f   :  { %v1079_v3 = vpop.eup %1078  ;;  %753 = vst [vmem:[#allocation2 + $0x60] sm:$0xff] %v721_v60  ;;  %v638_v4 = vadd.f32 1.0, %v1077_v63  ;;  %1082 = vtanh.f32 %v511_v61  ;;  %v481_v5 = vmul.f32 0.5, %v319_v2  ;;  %v408_v6 = vpop.f32.mrf.mxu1 }
 0x130   :  { %v1081_v7 = vpop.eup %1080  ;;  %v701_v8 = vmul.f32 0.5, %v637_v0  ;;  %v607_v9 = vadd.f32 1.0, %v1079_v3  ;;  %1084 = vtanh.f32 %v512_v1  ;;  %v482_v10 = vmul.f32 0.5, %v408_v6 }
 0x131   :  { %v702_v11 = vmul.f32 0.5, %v638_v4  ;;  %v608_v12 = vadd.f32 1.0, %v1081_v7  ;;  %1086 = vtanh.f32 %v481_v5 }
 0x132   :  { %v671_v13 = vmul.f32 0.5, %v607_v9  ;;  %1088 = vtanh.f32 %v482_v10 }
 0x133   :  { %v737_v14 = vpack.c.bf16 %v702_v11, %v701_v8  ;;  %v672_v15 = vmul.f32 0.5, %v608_v12 }
 0x134   :  { %v359_v16 = vpop.f32.mrf.mxu2 }
 0x135   :  { %v1083_v17 = vpop.eup %1082  ;;  %769 = vst [vmem:[#allocation2 + $0xe0] sm:$0xff] %v737_v14  ;;  %v722_v18 = vpack.c.bf16 %v672_v15, %v671_v13  ;;  %v513_v19 = vmul.f32 0.5, %v359_v16  ;;  %v448_v20 = vpop.f32.mrf.mxu3 }
 0x136   :  { %v1085_v21 = vpop.eup %1084  ;;  %v639_v22 = vadd.f32 1.0, %v1083_v17  ;;  %v514_v23 = vmul.f32 0.5, %v448_v20  ;;  %v321_v24 = vpop.f32.mrf.mxu0 }
 0x137   :  { %v1087_v25 = vpop.eup %1086  ;;  %754 = vst [vmem:[#allocation2 + $0x68] sm:$0xff] %v722_v18  ;;  %v640_v26 = vadd.f32 1.0, %v1085_v21  ;;  %1090 = vtanh.f32 %v513_v19  ;;  %v483_v27 = vmul.f32 0.5, %v321_v24  ;;  %v410_v28 = vpop.f32.mrf.mxu1 }
 0x138   :  { %v1089_v29 = vpop.eup %1088  ;;  %v703_v30 = vmul.f32 0.5, %v639_v22  ;;  %v609_v31 = vadd.f32 1.0, %v1087_v25  ;;  %1092 = vtanh.f32 %v514_v23  ;;  %v484_v32 = vmul.f32 0.5, %v410_v28 }
 0x139   :  { %v704_v33 = vmul.f32 0.5, %v640_v26  ;;  %v610_v34 = vadd.f32 1.0, %v1089_v29  ;;  %1094 = vtanh.f32 %v483_v27 }
 0x13a   :  { %v673_v35 = vmul.f32 0.5, %v609_v31  ;;  %1096 = vtanh.f32 %v484_v32 }
 0x13b   :  { %v738_v36 = vpack.c.bf16 %v704_v33, %v703_v30  ;;  %v674_v37 = vmul.f32 0.5, %v610_v34 }
 0x13c   :  { %v361_v38 = vpop.f32.mrf.mxu2 }
 0x13d   :  { %v1091_v39 = vpop.eup %1090  ;;  %770 = vst [vmem:[#allocation2 + $0xe8] sm:$0xff] %v738_v36  ;;  %v723_v40 = vpack.c.bf16 %v674_v37, %v673_v35  ;;  %v515_v41 = vmul.f32 0.5, %v361_v38  ;;  %v450_v42 = vpop.f32.mrf.mxu3 }
 0x13e   :  { %v1093_v43 = vpop.eup %1092  ;;  %v641_v44 = vadd.f32 1.0, %v1091_v39  ;;  %v516_v45 = vmul.f32 0.5, %v450_v42 }
 0x13f   :  { %v1095_v46 = vpop.eup %1094  ;;  %755 = vst [vmem:[#allocation2 + $0x70] sm:$0xff] %v723_v40  ;;  %v642_v47 = vadd.f32 1.0, %v1093_v43  ;;  %1098 = vtanh.f32 %v515_v41 }
 0x140   :  { %v1097_v48 = vpop.eup %1096  ;;  %v705_v49 = vmul.f32 0.5, %v641_v44  ;;  %v611_v50 = vadd.f32 1.0, %v1095_v46  ;;  %1100 = vtanh.f32 %v516_v45 }
 0x141   :  { %v706_v51 = vmul.f32 0.5, %v642_v47  ;;  %v612_v52 = vadd.f32 1.0, %v1097_v48 }
 0x142   :  { %v675_v53 = vmul.f32 0.5, %v611_v50 }
 0x143   :  { %v739_v54 = vpack.c.bf16 %v706_v51, %v705_v49  ;;  %v676_v55 = vmul.f32 0.5, %v612_v52 }
 0x145   :  { %v1099_v56 = vpop.eup %1098  ;;  %771 = vst [vmem:[#allocation2 + $0xf0] sm:$0xff] %v739_v54  ;;  %v724_v57 = vpack.c.bf16 %v676_v55, %v675_v53 }
 0x146   :  { %v1101_v58 = vpop.eup %1100  ;;  %v643_v59 = vadd.f32 1.0, %v1099_v56 }
 0x147   :  { %756 = vst [vmem:[#allocation2 + $0x78] sm:$0xff] %v724_v57  ;;  %v644_v60 = vadd.f32 1.0, %v1101_v58 }
 0x148   :  { %v707_v61 = vmul.f32 0.5, %v643_v59 }
 0x149   :  { %v708_v62 = vmul.f32 0.5, %v644_v60 }
 0x14b   :  { %v740_v63 = vpack.c.bf16 %v708_v62, %v707_v61 }
 0x14d   :  { %772 = vst [vmem:[#allocation2 + $0xf8] sm:$0xff] %v740_v63 }
 0x14e   :  { %785 = dma.vmem_to_hbm [thread:$0]  %s778_s12, 4096, %s780_s15, [#allocation3], %s1129_s16, %s1129_s16, %s1130_s17  }
 0x14f   :  { %1126 = dma.done.wait [#allocation3], 4096  }
 0x150   :  { %1127 = vsyncadd [#allocation3], 4294963200 }
 0x151   :  { %790 = vsyncpa [#allocation3], 1 }

// kernel: graphsage_forward_padded.4
= control target key start
LH: loop header
LB: loop body
LE: loop exit
PB: predicated region body
PF: predicated region fallthrough
CT: control target
= control target key end

     0   :  { %10 = vsyncpa [#allocation3], 0  ;;  %s2007_s0 = inlined_call_operand.hbm [shape: bf16[256,256], index: 0, kind: input, shape index: {}]   ;;  %s2008_s1 = inlined_call_operand.vmem [shape: bf16[256,128], index: 1, kind: input, shape index: {}]   ;;  %s2009_s2 = inlined_call_operand.hbm [shape: bf16[128,128], index: 2, kind: input, shape index: {}]   ;;  %s2010_s3 = inlined_call_operand.hbm [shape: bf16[128,128], index: 3, kind: input, shape index: {}]   ;;  %s2011_s4 = inlined_call_operand.hbm [shape: f32[8,128], index: 4, kind: input, shape index: {}]   ;;  %s2012_s5 = inlined_call_operand.vmem [shape: bf16[256,128], index: 5, kind: output, shape index: {}]  }
   0x1   :  { %11 = vsyncpa [#allocation5], 0  ;;  %s32_s20 = sshll.u32 %s2009_s2, 4  ;;  %s33_s20 = int_to_ptr.hbm [resolvable:$true] %s32_s20 }
   0x2   :  { %12 = vsyncpa [#allocation8], 0  ;;  %s1779_s21 = smov [#allocation4]   ;;  %s17_s25 = sshll.u32 %s2007_s0, 4  ;;  %s18_s25 = int_to_ptr.hbm [resolvable:$true] %s17_s25 }
   0x3   :  { %s34_s22 = sshll.u32 %s1779_s21, 4  ;;  %s1780_s26 = smov 64   ;;  %s35_s22 = int_to_ptr.vmem [resolvable:$true] %s34_s22 }
   0x4   :  { %s1781_s27 = smov 4   ;;  %s1782_s28 = smov [#allocation2]  }
   0x5   :  { %40 = dma.hbm_to_vmem [thread:$0]  %s33_s20, 1024, %s35_s22, [#allocation5], %s1780_s26, %s1780_s26, %s1781_s27  }
   0x6   :  { %s19_s29 = sshll.u32 %s1782_s28, 4  ;;  %s1783_s30 = smov 128   ;;  %s20_s29 = int_to_ptr.vmem [resolvable:$true] %s19_s29 }
   0x7   :  { %s1784_s6 = smov 8   ;;  %s45_s8 = sshll.u32 %s2010_s3, 4  ;;  %s46_s8 = int_to_ptr.hbm [resolvable:$true] %s45_s8 }
   0x8   :  { %25 = dma.hbm_to_vmem [thread:$0]  %s18_s25, 4096, %s20_s29, [#allocation3], %s1783_s30, %s1783_s30, %s1784_s6  }
   0x9   :  { %s1785_s9 = smov [#allocation6]   ;;  %s59_s12 = sshll.u32 %s2011_s4, 4  ;;  %s60_s12 = int_to_ptr.hbm [resolvable:$true] %s59_s12 }
   0xa   :  { %s47_s10 = sshll.u32 %s1785_s9, 4  ;;  %s1786_s13 = smov [#allocation7]   ;;  %s48_s10 = int_to_ptr.vmem [resolvable:$true] %s47_s10 }
   0xb   :  { %53 = dma.hbm_to_vmem [thread:$0]  %s46_s8, 1024, %s48_s10, [#allocation5], %s1780_s26, %s1780_s26, %s1781_s27  }
   0xc   :  { %s61_s14 = sshll.u32 %s1786_s13, 4  ;;  %s62_s14 = int_to_ptr.vmem [resolvable:$true] %s61_s14 }
   0xd   :  { %64 = dma.hbm_to_vmem [thread:$0]  %s60_s12, 128, %s62_s14, [#allocation8]  }
   0xe   :  { %1773 = dma.done.wait [#allocation3], 4096  }
   0xf   :  { %1774 = vsyncadd [#allocation3], 4294963200 }
  0x10   :  { %1775 = dma.done.wait [#allocation5], 2048  }
  0x11   :  { %1776 = vsyncadd [#allocation5], 4294965248 }
  0x12   :  { %1777 = dma.done.wait [#allocation8], 128  }
  0x13   :  { %1778 = vsyncadd [#allocation8], 4294967168  ;;  %v1548_v0 = vld [vmem:[%s2008_s1 + $0x38] sm:$0xff]  ;;  %v1547_v2 = vld [vmem:[%s2008_s1 + $0x30] sm:$0xff] }
  0x14   :  { %v1556_v1 = vld [vmem:[%s2008_s1 + $0x78] sm:$0xff]  ;;  %438 = vmatpush.bf16.msra.mxu0 %v1548_v0  ;;  %v1555_v3 = vld [vmem:[%s2008_s1 + $0x70] sm:$0xff]  ;;  %v1546_v4 = vld [vmem:[%s2008_s1 + $0x28] sm:$0xff] }
  0x15   :  { %527 = vmatpush.bf16.msra.mxu1 %v1556_v1  ;;  %v1554_v5 = vld [vmem:[%s2008_s1 + $0x68] sm:$0xff]  ;;  %v1545_v6 = vld [vmem:[%s2008_s1 + $0x20] sm:$0xff]  ;;  %v1544_v8 = vld [vmem:[%s2008_s1 + $0x18] sm:$0xff] }
  0x16   :  { %v1553_v7 = vld [vmem:[%s2008_s1 + $0x60] sm:$0xff]  ;;  %v1552_v9 = vld [vmem:[%s2008_s1 + $0x58] sm:$0xff]  ;;  %v1543_v10 = vld [vmem:[%s2008_s1 + $0x10] sm:$0xff] }
  0x17   :  { %v1551_v11 = vld [vmem:[%s2008_s1 + $0x50] sm:$0xff]  ;;  %v1542_v12 = vld [vmem:[%s2008_s1 + $0x8] sm:$0xff]  ;;  %v1541_v14 = vld [vmem:[%s2008_s1] sm:$0xff] }
  0x18   :  { %439 = vmatpush.bf16.msra.mxu0 %v1547_v2  ;;  %v1550_v13 = vld [vmem:[%s2008_s1 + $0x48] sm:$0xff]  ;;  %v1549_v15 = vld [vmem:[%s2008_s1 + $0x40] sm:$0xff]  ;;  %v1183_v22 = vld [vmem:[#allocation2 + $0x10] sm:$0xf] }
  0x19   :  { %528 = vmatpush.bf16.msra.mxu1 %v1555_v3  ;;  %v1175_v16 = vld [vmem:[#allocation2] sm:$0xf]  ;;  %v1510_v17 = vld [vmem:[#allocation2 + $0x4] sm:$0xf0]  ;;  %v1509_v18 = vld [vmem:[#allocation2 + $0x4] sm:$0xf] }
  0x1a   :  { %v1177_v19 = vld [vmem:[#allocation2 + $0x8] sm:$0xf0]  ;;  %v1176_v20 = vor.u32 %v1510_v17, %v1175_v16  ;;  %v1512_v23 = vld [vmem:[#allocation2 + $0x14] sm:$0xf0]  ;;  %v1511_v24 = vld [vmem:[#allocation2 + $0x14] sm:$0xf] }
  0x1b   :  { %v1180_v21 = vor.u32 %v1509_v18, %v1177_v19  ;;  %v1185_v25 = vld [vmem:[#allocation2 + $0x18] sm:$0xf0]  ;;  %v1184_v26 = vor.u32 %v1512_v23, %v1183_v22  ;;  %v1191_v28 = vld [vmem:[#allocation2 + $0x20] sm:$0xf]  ;;  %v1514_v29 = vld [vmem:[#allocation2 + $0x24] sm:$0xf0] }
  0x1c   :  { %440 = vmatpush.bf16.msra.mxu0 %v1546_v4  ;;  %v1188_v27 = vor.u32 %v1511_v24, %v1185_v25  ;;  %v1513_v30 = vld [vmem:[#allocation2 + $0x24] sm:$0xf]  ;;  %v1193_v31 = vld [vmem:[#allocation2 + $0x28] sm:$0xf0]  ;;  %v1192_v32 = vor.u32 %v1514_v29, %v1191_v28  ;;  %v1199_v34 = vld [vmem:[#allocation2 + $0x30] sm:$0xf] }
  0x1d   :  { %529 = vmatpush.bf16.msra.mxu1 %v1554_v5  ;;  %v1196_v33 = vor.u32 %v1513_v30, %v1193_v31  ;;  %v1516_v35 = vld [vmem:[#allocation2 + $0x34] sm:$0xf0]  ;;  %v1515_v36 = vld [vmem:[#allocation2 + $0x34] sm:$0xf]  ;;  %v1201_v37 = vld [vmem:[#allocation2 + $0x38] sm:$0xf0] }
  0x1e   :  { %v1200_v38 = vor.u32 %v1516_v35, %v1199_v34  ;;  %v1204_v39 = vor.u32 %v1515_v36, %v1201_v37  ;;  %v1207_v40 = vld [vmem:[#allocation2 + $0x40] sm:$0xf]  ;;  %v1518_v41 = vld [vmem:[#allocation2 + $0x44] sm:$0xf0]  ;;  %v1517_v42 = vld [vmem:[#allocation2 + $0x44] sm:$0xf] }
  0x1f   :  { %v1209_v43 = vld [vmem:[#allocation2 + $0x48] sm:$0xf0]  ;;  %v1208_v44 = vor.u32 %v1518_v41, %v1207_v40  ;;  %v1564_v46 = vld [vmem:[#allocation4 + $0x38] sm:$0xff]  ;;  %v1563_v48 = vld [vmem:[#allocation4 + $0x30] sm:$0xff] }
  0x20   :  { %441 = vmatpush.bf16.msra.mxu0 %v1545_v6  ;;  %v1212_v45 = vor.u32 %v1517_v42, %v1209_v43  ;;  %v1572_v47 = vld [vmem:[#allocation6 + $0x38] sm:$0xff]  ;;  %945 = vmatpush.bf16.msra.mxu3 %v1564_v46  ;;  %v1571_v49 = vld [vmem:[#allocation6 + $0x30] sm:$0xff]  ;;  %v1562_v50 = vld [vmem:[#allocation4 + $0x28] sm:$0xff] }
  0x21   :  { %530 = vmatpush.bf16.msra.mxu1 %v1553_v7  ;;  %712 = vmatpush.bf16.msra.mxu2 %v1572_v47  ;;  %v1215_v51 = vld [vmem:[#allocation2 + $0x50] sm:$0xf]  ;;  %v1520_v52 = vld [vmem:[#allocation2 + $0x54] sm:$0xf0]  ;;  %v1519_v53 = vld [vmem:[#allocation2 + $0x54] sm:$0xf] }
  0x22   :  { %v1217_v54 = vld [vmem:[#allocation2 + $0x58] sm:$0xf0]  ;;  %v1561_v55 = vld [vmem:[#allocation4 + $0x20] sm:$0xff]  ;;  %v1216_v56 = vor.u32 %v1520_v52, %v1215_v51  ;;  %v1570_v58 = vld [vmem:[#allocation6 + $0x28] sm:$0xff] }
  0x23   :  { %v1220_v57 = vor.u32 %v1519_v53, %v1217_v54  ;;  %v1560_v59 = vld [vmem:[#allocation4 + $0x18] sm:$0xff]  ;;  %v1569_v60 = vld [vmem:[#allocation6 + $0x20] sm:$0xff]  ;;  %v1559_v61 = vld [vmem:[#allocation4 + $0x10] sm:$0xff] }
  0x24   :  { %442 = vmatpush.bf16.msra.mxu0 %v1544_v8  ;;  %946 = vmatpush.bf16.msra.mxu3 %v1563_v48  ;;  %v1568_v62 = vld [vmem:[#allocation6 + $0x18] sm:$0xff]  ;;  %v1558_v63 = vld [vmem:[#allocation4 + $0x8] sm:$0xff]  ;;  %v1223_v0 = vld [vmem:[#allocation2 + $0x60] sm:$0xf] }
  0x25   :  { %531 = vmatpush.bf16.msra.mxu1 %v1552_v9  ;;  %713 = vmatpush.bf16.msra.mxu2 %v1571_v49  ;;  %v1522_v1 = vld [vmem:[#allocation2 + $0x64] sm:$0xf0]  ;;  %v1521_v2 = vld [vmem:[#allocation2 + $0x64] sm:$0xf]  ;;  %v1225_v3 = vld [vmem:[#allocation2 + $0x68] sm:$0xf0] }
  0x26   :  { %v1224_v4 = vor.u32 %v1522_v1, %v1223_v0  ;;  %v1228_v5 = vor.u32 %v1521_v2, %v1225_v3  ;;  %v1567_v6 = vld [vmem:[#allocation6 + $0x10] sm:$0xff]  ;;  %v1557_v7 = vld [vmem:[#allocation4] sm:$0xff]  ;;  %v1566_v9 = vld [vmem:[#allocation6 + $0x8] sm:$0xff] }
  0x27   :  { %v1493_v8 = vld [vmem:[%s2008_s1] sm:$0xff]  ;;  %v1494_v17 = vld [vmem:[%s2008_s1 + $0x8] sm:$0xff]  ;;  %v1527_v34 = vld [vmem:[#allocation2 + $0x94] sm:$0xf] }
  0x28   :  { %443 = vmatpush.bf16.msra.mxu0 %v1543_v10  ;;  %947 = vmatpush.bf16.msra.mxu3 %v1562_v50  ;;  %v1565_v10 = vld [vmem:[#allocation6] sm:$0xff]  ;;  %v1526_v19 = vld [vmem:[#allocation2 + $0x84] sm:$0xf0]  ;;  %v1249_v35 = vld [vmem:[#allocation2 + $0x98] sm:$0xf0] }
  0x29   :  { %532 = vmatpush.bf16.msra.mxu1 %v1551_v11  ;;  %714 = vmatpush.bf16.msra.mxu2 %v1570_v58  ;;  %v1231_v11 = vld [vmem:[#allocation2 + $0x70] sm:$0xf]  ;;  %v1239_v18 = vld [vmem:[#allocation2 + $0x80] sm:$0xf]  ;;  %v1252_v37 = vor.u32 %v1527_v34, %v1249_v35  ;;  %v1496_v40 = vld [vmem:[%s2008_s1 + $0x18] sm:$0xff] }
  0x2a   :  { %v1240_v22 = vor.u32 %v1526_v19, %v1239_v18  ;;  %v1255_v46 = vld [vmem:[#allocation2 + $0xa0] sm:$0xf]  ;;  %v1530_v47 = vld [vmem:[#allocation2 + $0xa4] sm:$0xf0]  ;;  %v1529_v48 = vld [vmem:[#allocation2 + $0xa4] sm:$0xf] }
  0x2b   :  { %v1257_v49 = vld [vmem:[#allocation2 + $0xa8] sm:$0xf0]  ;;  %v1256_v50 = vor.u32 %v1530_v47, %v1255_v46  ;;  %v1497_v54 = vld [vmem:[%s2008_s1 + $0x20] sm:$0xff]  ;;  %v1499_v18 = vld [vmem:[%s2008_s1 + $0x30] sm:$0xff] }
  0x2c   :  { %444 = vmatpush.bf16.msra.mxu0 %v1542_v12  ;;  %948 = vmatpush.bf16.msra.mxu3 %v1561_v55  ;;  %v1524_v12 = vld [vmem:[#allocation2 + $0x74] sm:$0xf0]  ;;  %v1260_v51 = vor.u32 %v1529_v48, %v1257_v49  ;;  %v1501_v46 = vld [vmem:[%s2008_s1 + $0x40] sm:$0xff] }
  0x2d   :  { %533 = vmatpush.bf16.msra.mxu1 %v1550_v13  ;;  %715 = vmatpush.bf16.msra.mxu2 %v1569_v60  ;;  %v1523_v13 = vld [vmem:[#allocation2 + $0x74] sm:$0xf]  ;;  %v1263_v60 = vld [vmem:[#allocation2 + $0xb0] sm:$0xf] }
  0x30   :  { %445 = vmatpush.bf16.msra.mxu0 %v1541_v14  ;;  %949 = vmatpush.bf16.msra.mxu3 %v1560_v59  ;;  %v1233_v14 = vld [vmem:[#allocation2 + $0x78] sm:$0xf0] }
  0x31   :  { %534 = vmatpush.bf16.msra.mxu1 %v1549_v15  ;;  %716 = vmatpush.bf16.msra.mxu2 %v1568_v62  ;;  %v1232_v15 = vor.u32 %v1524_v12, %v1231_v11  ;;  %v1236_v16 = vor.u32 %v1523_v13, %v1233_v14  ;;  %v1531_v62 = vld [vmem:[#allocation2 + $0xb4] sm:$0xf]  ;;  %v1534_v11 = vld [vmem:[#allocation2 + $0xc4] sm:$0xf0]  ;;  %v1533_v12 = vld [vmem:[#allocation2 + $0xc4] sm:$0xf] }
  0x32   :  { %v1273_v13 = vld [vmem:[#allocation2 + $0xc8] sm:$0xf0] }
  0x33   :  { %446 = vmatmul.bf16.vlgmr.msra.gmra.mxu0 %v1176_v20  ;;  %v1525_v20 = vld [vmem:[#allocation2 + $0x84] sm:$0xf] }
  0x34   :  { %535 = vmatmul.bf16.vlgmr.msra.gmra.mxu1 %v1180_v21  ;;  %950 = vmatpush.bf16.msra.mxu3 %v1559_v61  ;;  %v1241_v21 = vld [vmem:[#allocation2 + $0x88] sm:$0xf0]  ;;  %v1532_v61 = vld [vmem:[#allocation2 + $0xb4] sm:$0xf0] }
  0x35   :  { %717 = vmatpush.bf16.msra.mxu2 %v1567_v6  ;;  %v1244_v23 = vor.u32 %v1525_v20, %v1241_v21  ;;  %v1264_v0 = vor.u32 %v1532_v61, %v1263_v60 }
  0x38   :  { %951 = vmatpush.bf16.msra.mxu3 %v1558_v63  ;;  %v1265_v63 = vld [vmem:[#allocation2 + $0xb8] sm:$0xf0] }
  0x39   :  { %718 = vmatpush.bf16.msra.mxu2 %v1566_v9  ;;  %v1268_v1 = vor.u32 %v1531_v62, %v1265_v63  ;;  %v1502_v62 = vld [vmem:[%s2008_s1 + $0x48] sm:$0xff] }
  0x3c   :  { %952 = vmatpush.bf16.msra.mxu3 %v1557_v7 }
  0x3d   :  { %719 = vmatpush.bf16.msra.mxu2 %v1565_v10  ;;  %v1271_v10 = vld [vmem:[#allocation2 + $0xc0] sm:$0xf] }
  0x3e   :  { %v1272_v14 = vor.u32 %v1534_v11, %v1271_v10 }
  0x3f   :  { %953 = vmatmul.bf16.vlgmr.msra.gmra.mxu3 %v1493_v8 }
  0x43   :  { %451 = vmatmul.bf16.gmra.mxu0 %v1184_v26  ;;  %v1495_v26 = vld [vmem:[%s2008_s1 + $0x10] sm:$0xff] }
  0x44   :  { %540 = vmatmul.bf16.gmra.mxu1 %v1188_v27 }
  0x4f   :  { %958 = vmatmul.bf16.gmra.mxu3 %v1494_v17 }
  0x53   :  { %456 = vmatmul.bf16.gmra.mxu0 %v1192_v32  ;;  %v1247_v32 = vld [vmem:[#allocation2 + $0x90] sm:$0xf] }
  0x54   :  { %545 = vmatmul.bf16.gmra.mxu1 %v1196_v33  ;;  %v1528_v33 = vld [vmem:[#allocation2 + $0x94] sm:$0xf0] }
  0x55   :  { %v1248_v36 = vor.u32 %v1528_v33, %v1247_v32  ;;  %v1500_v32 = vld [vmem:[%s2008_s1 + $0x38] sm:$0xff] }
  0x5f   :  { %963 = vmatmul.bf16.gmra.mxu3 %v1495_v26  ;;  %v1535_v26 = vld [vmem:[#allocation2 + $0xd4] sm:$0xf] }
  0x63   :  { %461 = vmatmul.bf16.gmra.mxu0 %v1200_v38 }
  0x64   :  { %550 = vmatmul.bf16.gmra.mxu1 %v1204_v39 }
  0x6f   :  { %968 = vmatmul.bf16.gmra.mxu3 %v1496_v40  ;;  %v1537_v40 = vld [vmem:[#allocation2 + $0xe4] sm:$0xf] }
  0x73   :  { %466 = vmatmul.bf16.gmra.mxu0 %v1208_v44 }
  0x74   :  { %555 = vmatmul.bf16.gmra.mxu1 %v1212_v45 }
  0x7f   :  { %973 = vmatmul.bf16.gmra.mxu3 %v1497_v54  ;;  %v1540_v54 = vld [vmem:[#allocation2 + $0xf4] sm:$0xf0] }
  0x83   :  { %471 = vmatmul.bf16.gmra.mxu0 %v1216_v56 }
  0x84   :  { %560 = vmatmul.bf16.gmra.mxu1 %v1220_v57 }
  0x93   :  { %476 = vmatmul.bf16.gmra.mxu0 %v1224_v4  ;;  %v1498_v4 = vld [vmem:[%s2008_s1 + $0x28] sm:$0xff] }
  0x94   :  { %565 = vmatmul.bf16.gmra.mxu1 %v1228_v5  ;;  %978 = vmatmul.bf16.gmra.mxu3 %v1498_v4 }
  0xa3   :  { %481 = vmatmul.bf16.gmra.mxu0 %v1232_v15  ;;  %v1276_v15 = vor.u32 %v1533_v12, %v1273_v13 }
  0xa4   :  { %570 = vmatmul.bf16.gmra.mxu1 %v1236_v16  ;;  %983 = vmatmul.bf16.gmra.mxu3 %v1499_v18 }
  0xb0   :  { %v447_v24 = vpop.f32.mrf.mxu0 }
  0xb1   :  { %v536_v25 = vpop.f32.mrf.mxu1 }
  0xb2   :  { %v537_v29 = vadd.f32 %v536_v25, %v447_v24  ;;  %v1279_v24 = vld [vmem:[#allocation2 + $0xd0] sm:$0xf]  ;;  %v1536_v25 = vld [vmem:[#allocation2 + $0xd4] sm:$0xf0] }
  0xb3   :  { %486 = vmatmul.bf16.gmra.mxu0 %v1240_v22 }
  0xb4   :  { %575 = vmatmul.bf16.gmra.mxu1 %v1244_v23  ;;  %988 = vmatmul.bf16.gmra.mxu3 %v1500_v32 }
  0xb8   :  { %v449_v27 = vpop.f32.mrf.mxu0 }
  0xb9   :  { %v538_v28 = vpop.f32.mrf.mxu1 }
  0xba   :  { %v539_v30 = vadd.f32 %v538_v28, %v449_v27  ;;  %v1281_v27 = vld [vmem:[#allocation2 + $0xd8] sm:$0xf0]  ;;  %v1280_v28 = vor.u32 %v1536_v25, %v1279_v24 }
  0xbc   :  { %v632_v31 = vpack.c.bf16 %v539_v30, %v537_v29  ;;  %v1284_v29 = vor.u32 %v1535_v26, %v1281_v27 }
  0xbe   :  { %720 = vmatmul.bf16.vlgmr.msra.gmra.mxu2 %v632_v31 }
  0xc0   :  { %v452_v38 = vpop.f32.mrf.mxu0 }
  0xc1   :  { %v541_v39 = vpop.f32.mrf.mxu1 }
  0xc2   :  { %v542_v43 = vadd.f32 %v541_v39, %v452_v38  ;;  %v1287_v38 = vld [vmem:[#allocation2 + $0xe0] sm:$0xf]  ;;  %v1538_v39 = vld [vmem:[#allocation2 + $0xe4] sm:$0xf0] }
  0xc3   :  { %491 = vmatmul.bf16.gmra.mxu0 %v1248_v36 }
  0xc4   :  { %580 = vmatmul.bf16.gmra.mxu1 %v1252_v37  ;;  %993 = vmatmul.bf16.gmra.mxu3 %v1501_v46 }
  0xc8   :  { %v454_v41 = vpop.f32.mrf.mxu0 }
  0xc9   :  { %v543_v42 = vpop.f32.mrf.mxu1 }
  0xca   :  { %v544_v44 = vadd.f32 %v543_v42, %v454_v41  ;;  %v1289_v41 = vld [vmem:[#allocation2 + $0xe8] sm:$0xf0]  ;;  %v1288_v42 = vor.u32 %v1538_v39, %v1287_v38  ;;  %v1505_v39 = vld [vmem:[%s2008_s1 + $0x60] sm:$0xff] }
  0xcc   :  { %v633_v45 = vpack.c.bf16 %v544_v44, %v542_v43  ;;  %v1292_v43 = vor.u32 %v1537_v40, %v1289_v41 }
  0xce   :  { %725 = vmatmul.bf16.gmra.mxu2 %v633_v45 }
  0xd0   :  { %v457_v52 = vpop.f32.mrf.mxu0 }
  0xd1   :  { %v546_v53 = vpop.f32.mrf.mxu1 }
  0xd2   :  { %v547_v57 = vadd.f32 %v546_v53, %v457_v52  ;;  %v1295_v53 = vld [vmem:[#allocation2 + $0xf0] sm:$0xf] }
  0xd3   :  { %496 = vmatmul.bf16.gmra.mxu0 %v1256_v50 }
  0xd4   :  { %585 = vmatmul.bf16.gmra.mxu1 %v1260_v51  ;;  %v954_v51 = vpop.f32.mrf.mxu3  ;;  %998 = vmatmul.bf16.gmra.mxu3 %v1502_v62 }
  0xd8   :  { %v459_v55 = vpop.f32.mrf.mxu0 }
  0xd9   :  { %v548_v56 = vpop.f32.mrf.mxu1 }
  0xda   :  { %v549_v58 = vadd.f32 %v548_v56, %v459_v55  ;;  %v1539_v55 = vld [vmem:[#allocation2 + $0xf4] sm:$0xf]  ;;  %v1297_v56 = vld [vmem:[#allocation2 + $0xf8] sm:$0xf0] }
  0xdc   :  { %v634_v59 = vpack.c.bf16 %v549_v58, %v547_v57  ;;  %v1296_v57 = vor.u32 %v1540_v54, %v1295_v53  ;;  %v1300_v58 = vor.u32 %v1539_v55, %v1297_v56  ;;  %v956_v61 = vpop.f32.mrf.mxu3 }
  0xde   :  { %730 = vmatmul.bf16.gmra.mxu2 %v634_v59 }
  0xe0   :  { %v462_v2 = vpop.f32.mrf.mxu0 }
  0xe1   :  { %v551_v3 = vpop.f32.mrf.mxu1 }
  0xe2   :  { %v552_v7 = vadd.f32 %v551_v3, %v462_v2 }
  0xe3   :  { %501 = vmatmul.bf16.gmra.mxu0 %v1264_v0 }
  0xe4   :  { %590 = vmatmul.bf16.gmra.mxu1 %v1268_v1  ;;  %v959_v3 = vpop.f32.mrf.mxu3 }
  0xe8   :  { %v464_v5 = vpop.f32.mrf.mxu0 }
  0xe9   :  { %v553_v6 = vpop.f32.mrf.mxu1 }
  0xea   :  { %v554_v8 = vadd.f32 %v553_v6, %v464_v5 }
  0xec   :  { %v635_v9 = vpack.c.bf16 %v554_v8, %v552_v7  ;;  %v961_v7 = vpop.f32.mrf.mxu3  ;;  %v1503_v8 = vld [vmem:[%s2008_s1 + $0x50] sm:$0xff] }
  0xed   :  { %1003 = vmatmul.bf16.gmra.mxu3 %v1503_v8 }
  0xee   :  { %735 = vmatmul.bf16.gmra.mxu2 %v635_v9 }
  0xf0   :  { %v467_v16 = vpop.f32.mrf.mxu0 }
  0xf1   :  { %v556_v17 = vpop.f32.mrf.mxu1 }
  0xf2   :  { %v557_v21 = vadd.f32 %v556_v17, %v467_v16 }
  0xf3   :  { %506 = vmatmul.bf16.gmra.mxu0 %v1272_v14 }
  0xf4   :  { %595 = vmatmul.bf16.gmra.mxu1 %v1276_v15  ;;  %v964_v13 = vpop.f32.mrf.mxu3 }
  0xf8   :  { %v469_v19 = vpop.f32.mrf.mxu0 }
  0xf9   :  { %v558_v20 = vpop.f32.mrf.mxu1 }
  0xfa   :  { %v559_v22 = vadd.f32 %v558_v20, %v469_v19  ;;  %v1504_v19 = vld [vmem:[%s2008_s1 + $0x58] sm:$0xff] }
  0xfc   :  { %v636_v23 = vpack.c.bf16 %v559_v22, %v557_v21  ;;  %v966_v18 = vpop.f32.mrf.mxu3  ;;  %v1913_v21 = vld [vmem:[#allocation7] ss:$0 sm:$0xff] }
  0xfd   :  { %1008 = vmatmul.bf16.gmra.mxu3 %v1504_v19 }
  0xfe   :  { %740 = vmatmul.bf16.gmra.mxu2 %v636_v23 }
 0x100   :  { %v472_v30 = vpop.f32.mrf.mxu0 }
 0x101   :  { %v561_v31 = vpop.f32.mrf.mxu1 }
 0x102   :  { %v562_v35 = vadd.f32 %v561_v31, %v472_v30 }
 0x103   :  { %511 = vmatmul.bf16.gmra.mxu0 %v1280_v28 }
 0x104   :  { %600 = vmatmul.bf16.gmra.mxu1 %v1284_v29  ;;  %v969_v27 = vpop.f32.mrf.mxu3 }
 0x108   :  { %v474_v33 = vpop.f32.mrf.mxu0 }
 0x109   :  { %v563_v34 = vpop.f32.mrf.mxu1 }
 0x10a   :  { %v564_v36 = vadd.f32 %v563_v34, %v474_v33 }
 0x10c   :  { %v637_v37 = vpack.c.bf16 %v564_v36, %v562_v35  ;;  %v971_v38 = vpop.f32.mrf.mxu3 }
 0x10d   :  { %1013 = vmatmul.bf16.gmra.mxu3 %v1505_v39 }
 0x10e   :  { %745 = vmatmul.bf16.gmra.mxu2 %v637_v37 }
 0x110   :  { %v477_v44 = vpop.f32.mrf.mxu0 }
 0x111   :  { %v566_v45 = vpop.f32.mrf.mxu1 }
 0x112   :  { %v567_v49 = vadd.f32 %v566_v45, %v477_v44 }
 0x113   :  { %516 = vmatmul.bf16.gmra.mxu0 %v1288_v42 }
 0x114   :  { %605 = vmatmul.bf16.gmra.mxu1 %v1292_v43  ;;  %v974_v46 = vpop.f32.mrf.mxu3 }
 0x118   :  { %v479_v47 = vpop.f32.mrf.mxu0 }
 0x119   :  { %v568_v48 = vpop.f32.mrf.mxu1 }
 0x11a   :  { %v569_v50 = vadd.f32 %v568_v48, %v479_v47 }
 0x11c   :  { %v638_v52 = vpack.c.bf16 %v569_v50, %v567_v49 }
 0x11e   :  { %750 = vmatmul.bf16.gmra.mxu2 %v638_v52 }
 0x120   :  { %v482_v59 = vpop.f32.mrf.mxu0 }
 0x121   :  { %v571_v60 = vpop.f32.mrf.mxu1 }
 0x122   :  { %v572_v1 = vadd.f32 %v571_v60, %v482_v59 }
 0x123   :  { %521 = vmatmul.bf16.gmra.mxu0 %v1296_v57  ;;  %v976_v57 = vpop.f32.mrf.mxu3 }
 0x124   :  { %610 = vmatmul.bf16.gmra.mxu1 %v1300_v58  ;;  %v1506_v58 = vld [vmem:[%s2008_s1 + $0x68] sm:$0xff] }
 0x125   :  { %1018 = vmatmul.bf16.gmra.mxu3 %v1506_v58 }
 0x128   :  { %v484_v63 = vpop.f32.mrf.mxu0 }
 0x129   :  { %v573_v0 = vpop.f32.mrf.mxu1 }
 0x12a   :  { %v574_v2 = vadd.f32 %v573_v0, %v484_v63 }
 0x12c   :  { %v639_v4 = vpack.c.bf16 %v574_v2, %v572_v1  ;;  %v979_v1 = vpop.f32.mrf.mxu3 }
 0x12e   :  { %755 = vmatmul.bf16.gmra.mxu2 %v639_v4 }
 0x130   :  { %v487_v5 = vpop.f32.mrf.mxu0 }
 0x131   :  { %v576_v6 = vpop.f32.mrf.mxu1 }
 0x132   :  { %v577_v11 = vadd.f32 %v576_v6, %v487_v5 }
 0x138   :  { %v489_v9 = vpop.f32.mrf.mxu0 }
 0x139   :  { %v578_v10 = vpop.f32.mrf.mxu1 }
 0x13a   :  { %v579_v12 = vadd.f32 %v578_v10, %v489_v9 }
 0x13c   :  { %v640_v14 = vpack.c.bf16 %v579_v12, %v577_v11  ;;  %v981_v12 = vpop.f32.mrf.mxu3 }
 0x13e   :  { %760 = vmatmul.bf16.gmra.mxu2 %v640_v14 }
 0x140   :  { %v492_v15 = vpop.f32.mrf.mxu0 }
 0x141   :  { %v581_v16 = vpop.f32.mrf.mxu1  ;;  %v721_v17 = vpop.f32.mrf.mxu2 }
 0x142   :  { %v955_v20 = vadd.f32 %v954_v51, %v721_v17  ;;  %v582_v24 = vadd.f32 %v581_v16, %v492_v15 }
 0x144   :  { %v1036_v28 = vadd.f32 %v1913_v21, %v955_v20 }
 0x146   :  { %v1068_v32 = vmax.f32 %v1036_v28, 0.0 }
 0x148   :  { %v494_v22 = vpop.f32.mrf.mxu0 }
 0x149   :  { %v583_v23 = vpop.f32.mrf.mxu1  ;;  %v723_v26 = vpop.f32.mrf.mxu2 }
 0x14a   :  { %v584_v25 = vadd.f32 %v583_v23, %v494_v22  ;;  %v957_v29 = vadd.f32 %v956_v61, %v723_v26 }
 0x14c   :  { %v641_v30 = vpack.c.bf16 %v584_v25, %v582_v24  ;;  %v1037_v31 = vadd.f32 %v1913_v21, %v957_v29  ;;  %v984_v24 = vpop.f32.mrf.mxu3 }
 0x14e   :  { %765 = vmatmul.bf16.gmra.mxu2 %v641_v30  ;;  %v1069_v33 = vmax.f32 %v1037_v31, 0.0 }
 0x150   :  { %v1576_v34 = vpack.c.bf16 %v1069_v33, %v1068_v32  ;;  %v497_v35 = vpop.f32.mrf.mxu0  ;;  %v1508_v32 = vld [vmem:[%s2008_s1 + $0x78] sm:$0xff] }
 0x151   :  { %v586_v36 = vpop.f32.mrf.mxu1  ;;  %v726_v37 = vpop.f32.mrf.mxu2 }
 0x152   :  { %1577 = vst [vmem:[%s2012_s5] sm:$0xff] %v1576_v34   ;;  %v960_v40 = vadd.f32 %v959_v3, %v726_v37  ;;  %v587_v43 = vadd.f32 %v586_v36, %v497_v35 }
 0x154   :  { %v1038_v47 = vadd.f32 %v1913_v21, %v960_v40  ;;  %v986_v33 = vpop.f32.mrf.mxu3 }
 0x156   :  { %v1070_v51 = vmax.f32 %v1038_v47, 0.0 }
 0x158   :  { %v499_v41 = vpop.f32.mrf.mxu0 }
 0x159   :  { %v588_v42 = vpop.f32.mrf.mxu1  ;;  %v728_v45 = vpop.f32.mrf.mxu2 }
 0x15a   :  { %v589_v44 = vadd.f32 %v588_v42, %v499_v41  ;;  %v962_v48 = vadd.f32 %v961_v7, %v728_v45 }
 0x15c   :  { %v642_v49 = vpack.c.bf16 %v589_v44, %v587_v43  ;;  %v1039_v50 = vadd.f32 %v1913_v21, %v962_v48  ;;  %v989_v47 = vpop.f32.mrf.mxu3 }
 0x15e   :  { %770 = vmatmul.bf16.gmra.mxu2 %v642_v49  ;;  %v1071_v52 = vmax.f32 %v1039_v50, 0.0 }
 0x160   :  { %v1581_v53 = vpack.c.bf16 %v1071_v52, %v1070_v51  ;;  %v502_v54 = vpop.f32.mrf.mxu0 }
 0x161   :  { %v591_v55 = vpop.f32.mrf.mxu1  ;;  %v731_v56 = vpop.f32.mrf.mxu2 }
 0x162   :  { %1653 = vst [vmem:[%s2012_s5 + $0x8] sm:$0xff] %v1581_v53   ;;  %v965_v59 = vadd.f32 %v964_v13, %v731_v56  ;;  %v592_v62 = vadd.f32 %v591_v55, %v502_v54  ;;  %v1507_v13 = vld [vmem:[%s2008_s1 + $0x70] sm:$0xff] }
 0x163   :  { %1023 = vmatmul.bf16.gmra.mxu3 %v1507_v13 }
 0x164   :  { %v1040_v2 = vadd.f32 %v1913_v21, %v965_v59 }
 0x166   :  { %v1072_v6 = vmax.f32 %v1040_v2, 0.0 }
 0x168   :  { %v504_v60 = vpop.f32.mrf.mxu0 }
 0x169   :  { %v593_v61 = vpop.f32.mrf.mxu1  ;;  %v733_v0 = vpop.f32.mrf.mxu2 }
 0x16a   :  { %v594_v63 = vadd.f32 %v593_v61, %v504_v60  ;;  %v967_v3 = vadd.f32 %v966_v18, %v733_v0 }
 0x16c   :  { %v643_v4 = vpack.c.bf16 %v594_v63, %v592_v62  ;;  %v1041_v5 = vadd.f32 %v1913_v21, %v967_v3 }
 0x16e   :  { %775 = vmatmul.bf16.gmra.mxu2 %v643_v4  ;;  %v1073_v7 = vmax.f32 %v1041_v5, 0.0 }
 0x170   :  { %v1586_v8 = vpack.c.bf16 %v1073_v7, %v1072_v6  ;;  %v507_v9 = vpop.f32.mrf.mxu0 }
 0x171   :  { %v596_v10 = vpop.f32.mrf.mxu1  ;;  %v736_v11 = vpop.f32.mrf.mxu2 }
 0x172   :  { %1654 = vst [vmem:[%s2012_s5 + $0x10] sm:$0xff] %v1586_v8   ;;  %v970_v14 = vadd.f32 %v969_v27, %v736_v11  ;;  %v597_v17 = vadd.f32 %v596_v10, %v507_v9 }
 0x173   :  { %1028 = vmatmul.bf16.gmra.mxu3 %v1508_v32 }
 0x174   :  { %v1042_v20 = vadd.f32 %v1913_v21, %v970_v14 }
 0x176   :  { %v1074_v26 = vmax.f32 %v1042_v20, 0.0 }
 0x178   :  { %v509_v15 = vpop.f32.mrf.mxu0 }
 0x179   :  { %v598_v16 = vpop.f32.mrf.mxu1  ;;  %v738_v19 = vpop.f32.mrf.mxu2 }
 0x17a   :  { %v599_v18 = vadd.f32 %v598_v16, %v509_v15  ;;  %v972_v22 = vadd.f32 %v971_v38, %v738_v19 }
 0x17c   :  { %v644_v23 = vpack.c.bf16 %v599_v18, %v597_v17  ;;  %v1043_v25 = vadd.f32 %v1913_v21, %v972_v22 }
 0x17e   :  { %780 = vmatmul.bf16.gmra.mxu2 %v644_v23  ;;  %v1075_v28 = vmax.f32 %v1043_v25, 0.0 }
 0x180   :  { %v1591_v29 = vpack.c.bf16 %v1075_v28, %v1074_v26  ;;  %v512_v30 = vpop.f32.mrf.mxu0 }
 0x181   :  { %v601_v31 = vpop.f32.mrf.mxu1  ;;  %v741_v27 = vpop.f32.mrf.mxu2 }
 0x182   :  { %1655 = vst [vmem:[%s2012_s5 + $0x18] sm:$0xff] %v1591_v29   ;;  %v975_v34 = vadd.f32 %v974_v46, %v741_v27  ;;  %v602_v37 = vadd.f32 %v601_v31, %v512_v30 }
 0x184   :  { %v1044_v40 = vadd.f32 %v1913_v21, %v975_v34 }
 0x186   :  { %v1076_v44 = vmax.f32 %v1044_v40, 0.0 }
 0x188   :  { %v514_v35 = vpop.f32.mrf.mxu0 }
 0x189   :  { %v603_v36 = vpop.f32.mrf.mxu1  ;;  %v743_v39 = vpop.f32.mrf.mxu2 }
 0x18a   :  { %v604_v38 = vadd.f32 %v603_v36, %v514_v35  ;;  %v977_v41 = vadd.f32 %v976_v57, %v743_v39  ;;  %v991_v57 = vpop.f32.mrf.mxu3 }
 0x18c   :  { %v645_v42 = vpack.c.bf16 %v604_v38, %v602_v37  ;;  %v1045_v43 = vadd.f32 %v1913_v21, %v977_v41 }
 0x18e   :  { %785 = vmatmul.bf16.gmra.mxu2 %v645_v42  ;;  %v1077_v45 = vmax.f32 %v1045_v43, 0.0 }
 0x190   :  { %v1596_v48 = vpack.c.bf16 %v1077_v45, %v1076_v44  ;;  %v517_v49 = vpop.f32.mrf.mxu0 }
 0x191   :  { %v606_v50 = vpop.f32.mrf.mxu1  ;;  %v746_v46 = vpop.f32.mrf.mxu2 }
 0x192   :  { %1656 = vst [vmem:[%s2012_s5 + $0x20] sm:$0xff] %v1596_v48   ;;  %v980_v51 = vadd.f32 %v979_v1, %v746_v46  ;;  %v607_v54 = vadd.f32 %v606_v50, %v517_v49  ;;  %v994_v1 = vpop.f32.mrf.mxu3 }
 0x194   :  { %v1046_v58 = vadd.f32 %v1913_v21, %v980_v51 }
 0x196   :  { %v1078_v62 = vmax.f32 %v1046_v58, 0.0 }
 0x198   :  { %v519_v52 = vpop.f32.mrf.mxu0 }
 0x199   :  { %v608_v53 = vpop.f32.mrf.mxu1  ;;  %v748_v56 = vpop.f32.mrf.mxu2 }
 0x19a   :  { %v609_v55 = vadd.f32 %v608_v53, %v519_v52  ;;  %v982_v59 = vadd.f32 %v981_v12, %v748_v56  ;;  %v996_v15 = vpop.f32.mrf.mxu3 }
 0x19c   :  { %v646_v60 = vpack.c.bf16 %v609_v55, %v607_v54  ;;  %v1047_v61 = vadd.f32 %v1913_v21, %v982_v59 }
 0x19e   :  { %790 = vmatmul.bf16.gmra.mxu2 %v646_v60  ;;  %v1079_v63 = vmax.f32 %v1047_v61, 0.0 }
 0x1a0   :  { %v1601_v0 = vpack.c.bf16 %v1079_v63, %v1078_v62  ;;  %v522_v2 = vpop.f32.mrf.mxu0 }
 0x1a1   :  { %v611_v3 = vpop.f32.mrf.mxu1  ;;  %v751_v4 = vpop.f32.mrf.mxu2 }
 0x1a2   :  { %1657 = vst [vmem:[%s2012_s5 + $0x28] sm:$0xff] %v1601_v0   ;;  %v985_v5 = vadd.f32 %v984_v24, %v751_v4  ;;  %v612_v8 = vadd.f32 %v611_v3, %v522_v2  ;;  %v999_v22 = vpop.f32.mrf.mxu3 }
 0x1a4   :  { %v1048_v11 = vadd.f32 %v1913_v21, %v985_v5 }
 0x1a6   :  { %v1080_v16 = vmax.f32 %v1048_v11, 0.0 }
 0x1a8   :  { %v524_v6 = vpop.f32.mrf.mxu0 }
 0x1a9   :  { %v613_v7 = vpop.f32.mrf.mxu1  ;;  %v753_v10 = vpop.f32.mrf.mxu2 }
 0x1aa   :  { %v614_v9 = vadd.f32 %v613_v7, %v524_v6  ;;  %v987_v12 = vadd.f32 %v986_v33, %v753_v10  ;;  %v1001_v27 = vpop.f32.mrf.mxu3 }
 0x1ac   :  { %v647_v13 = vpack.c.bf16 %v614_v9, %v612_v8  ;;  %v1049_v14 = vadd.f32 %v1913_v21, %v987_v12 }
 0x1ae   :  { %795 = vmatmul.bf16.gmra.mxu2 %v647_v13  ;;  %v1081_v17 = vmax.f32 %v1049_v14, 0.0 }
 0x1b0   :  { %v1606_v18 = vpack.c.bf16 %v1081_v17, %v1080_v16 }
 0x1b1   :  { %v756_v19 = vpop.f32.mrf.mxu2 }
 0x1b2   :  { %1658 = vst [vmem:[%s2012_s5 + $0x30] sm:$0xff] %v1606_v18   ;;  %v990_v20 = vadd.f32 %v989_v47, %v756_v19  ;;  %v1004_v36 = vpop.f32.mrf.mxu3 }
 0x1b4   :  { %v1050_v24 = vadd.f32 %v1913_v21, %v990_v20 }
 0x1b6   :  { %v1082_v28 = vmax.f32 %v1050_v24, 0.0 }
 0x1b9   :  { %v758_v23 = vpop.f32.mrf.mxu2 }
 0x1ba   :  { %v992_v25 = vadd.f32 %v991_v57, %v758_v23  ;;  %v1006_v42 = vpop.f32.mrf.mxu3 }
 0x1bc   :  { %v1051_v26 = vadd.f32 %v1913_v21, %v992_v25 }
 0x1be   :  { %v1083_v29 = vmax.f32 %v1051_v26, 0.0 }
 0x1c0   :  { %v1611_v30 = vpack.c.bf16 %v1083_v29, %v1082_v28 }
 0x1c1   :  { %v761_v31 = vpop.f32.mrf.mxu2 }
 0x1c2   :  { %1659 = vst [vmem:[%s2012_s5 + $0x38] sm:$0xff] %v1611_v30   ;;  %v995_v32 = vadd.f32 %v994_v1, %v761_v31  ;;  %v1009_v46 = vpop.f32.mrf.mxu3 }
 0x1c4   :  { %v1052_v34 = vadd.f32 %v1913_v21, %v995_v32 }
 0x1c6   :  { %v1084_v38 = vmax.f32 %v1052_v34, 0.0 }
 0x1c9   :  { %v763_v33 = vpop.f32.mrf.mxu2 }
 0x1ca   :  { %v997_v35 = vadd.f32 %v996_v15, %v763_v33  ;;  %v1011_v55 = vpop.f32.mrf.mxu3 }
 0x1cc   :  { %v1053_v37 = vadd.f32 %v1913_v21, %v997_v35 }
 0x1ce   :  { %v1085_v39 = vmax.f32 %v1053_v37, 0.0 }
 0x1d0   :  { %v1616_v40 = vpack.c.bf16 %v1085_v39, %v1084_v38 }
 0x1d1   :  { %v766_v41 = vpop.f32.mrf.mxu2 }
 0x1d2   :  { %1660 = vst [vmem:[%s2012_s5 + $0x40] sm:$0xff] %v1616_v40   ;;  %v1000_v43 = vadd.f32 %v999_v22, %v766_v41  ;;  %v1014_v63 = vpop.f32.mrf.mxu3 }
 0x1d4   :  { %v1054_v45 = vadd.f32 %v1913_v21, %v1000_v43 }
 0x1d6   :  { %v1086_v49 = vmax.f32 %v1054_v45, 0.0 }
 0x1d9   :  { %v768_v44 = vpop.f32.mrf.mxu2 }
 0x1da   :  { %v1002_v47 = vadd.f32 %v1001_v27, %v768_v44  ;;  %v1016_v5 = vpop.f32.mrf.mxu3 }
 0x1dc   :  { %v1055_v48 = vadd.f32 %v1913_v21, %v1002_v47 }
 0x1de   :  { %v1087_v50 = vmax.f32 %v1055_v48, 0.0 }
 0x1e0   :  { %v1621_v51 = vpack.c.bf16 %v1087_v50, %v1086_v49 }
 0x1e1   :  { %v771_v52 = vpop.f32.mrf.mxu2 }
 0x1e2   :  { %1661 = vst [vmem:[%s2012_s5 + $0x48] sm:$0xff] %v1621_v51   ;;  %v1005_v53 = vadd.f32 %v1004_v36, %v771_v52  ;;  %v1019_v11 = vpop.f32.mrf.mxu3 }
 0x1e4   :  { %v1056_v56 = vadd.f32 %v1913_v21, %v1005_v53 }
 0x1e6   :  { %v1088_v59 = vmax.f32 %v1056_v56, 0.0 }
 0x1e9   :  { %v773_v54 = vpop.f32.mrf.mxu2 }
 0x1ea   :  { %v1007_v57 = vadd.f32 %v1006_v42, %v773_v54  ;;  %v1021_v20 = vpop.f32.mrf.mxu3 }
 0x1ec   :  { %v1057_v58 = vadd.f32 %v1913_v21, %v1007_v57 }
 0x1ee   :  { %v1089_v60 = vmax.f32 %v1057_v58, 0.0 }
 0x1f0   :  { %v1626_v61 = vpack.c.bf16 %v1089_v60, %v1088_v59 }
 0x1f1   :  { %v776_v62 = vpop.f32.mrf.mxu2 }
 0x1f2   :  { %1662 = vst [vmem:[%s2012_s5 + $0x50] sm:$0xff] %v1626_v61   ;;  %v1010_v0 = vadd.f32 %v1009_v46, %v776_v62  ;;  %v1024_v26 = vpop.f32.mrf.mxu3 }
 0x1f4   :  { %v1058_v3 = vadd.f32 %v1913_v21, %v1010_v0 }
 0x1f6   :  { %v1090_v6 = vmax.f32 %v1058_v3, 0.0 }
 0x1f9   :  { %v778_v2 = vpop.f32.mrf.mxu2 }
 0x1fa   :  { %v1012_v4 = vadd.f32 %v1011_v55, %v778_v2  ;;  %v1026_v32 = vpop.f32.mrf.mxu3 }
 0x1fc   :  { %v1059_v1 = vadd.f32 %v1913_v21, %v1012_v4 }
 0x1fe   :  { %v1091_v7 = vmax.f32 %v1059_v1, 0.0 }
 0x200   :  { %v1631_v8 = vpack.c.bf16 %v1091_v7, %v1090_v6 }
 0x201   :  { %v781_v9 = vpop.f32.mrf.mxu2 }
 0x202   :  { %1663 = vst [vmem:[%s2012_s5 + $0x58] sm:$0xff] %v1631_v8   ;;  %v1015_v10 = vadd.f32 %v1014_v63, %v781_v9  ;;  %v1029_v40 = vpop.f32.mrf.mxu3 }
 0x204   :  { %v1060_v13 = vadd.f32 %v1913_v21, %v1015_v10 }
 0x206   :  { %v1092_v16 = vmax.f32 %v1060_v13, 0.0 }
 0x209   :  { %v783_v12 = vpop.f32.mrf.mxu2 }
 0x20a   :  { %v1017_v14 = vadd.f32 %v1016_v5, %v783_v12  ;;  %v1031_v44 = vpop.f32.mrf.mxu3 }
 0x20c   :  { %v1061_v15 = vadd.f32 %v1913_v21, %v1017_v14 }
 0x20e   :  { %v1093_v17 = vmax.f32 %v1061_v15, 0.0 }
 0x210   :  { %v1636_v18 = vpack.c.bf16 %v1093_v17, %v1092_v16 }
 0x211   :  { %v786_v19 = vpop.f32.mrf.mxu2 }
 0x212   :  { %1664 = vst [vmem:[%s2012_s5 + $0x60] sm:$0xff] %v1636_v18   ;;  %v1020_v22 = vadd.f32 %v1019_v11, %v786_v19 }
 0x214   :  { %v1062_v24 = vadd.f32 %v1913_v21, %v1020_v22 }
 0x216   :  { %v1094_v29 = vmax.f32 %v1062_v24, 0.0 }
 0x219   :  { %v788_v23 = vpop.f32.mrf.mxu2 }
 0x21a   :  { %v1022_v25 = vadd.f32 %v1021_v20, %v788_v23 }
 0x21c   :  { %v1063_v28 = vadd.f32 %v1913_v21, %v1022_v25 }
 0x21e   :  { %v1095_v30 = vmax.f32 %v1063_v28, 0.0 }
 0x220   :  { %v1641_v31 = vpack.c.bf16 %v1095_v30, %v1094_v29 }
 0x221   :  { %v791_v27 = vpop.f32.mrf.mxu2 }
 0x222   :  { %1665 = vst [vmem:[%s2012_s5 + $0x68] sm:$0xff] %v1641_v31   ;;  %v1025_v33 = vadd.f32 %v1024_v26, %v791_v27 }
 0x224   :  { %v1064_v35 = vadd.f32 %v1913_v21, %v1025_v33 }
 0x226   :  { %v1096_v38 = vmax.f32 %v1064_v35, 0.0 }
 0x229   :  { %v793_v34 = vpop.f32.mrf.mxu2 }
 0x22a   :  { %v1027_v36 = vadd.f32 %v1026_v32, %v793_v34 }
 0x22c   :  { %v1065_v37 = vadd.f32 %v1913_v21, %v1027_v36 }
 0x22e   :  { %v1097_v39 = vmax.f32 %v1065_v37, 0.0 }
 0x230   :  { %v1646_v41 = vpack.c.bf16 %v1097_v39, %v1096_v38 }
 0x231   :  { %v796_v42 = vpop.f32.mrf.mxu2 }
 0x232   :  { %1666 = vst [vmem:[%s2012_s5 + $0x70] sm:$0xff] %v1646_v41   ;;  %v1030_v43 = vadd.f32 %v1029_v40, %v796_v42 }
 0x234   :  { %v1066_v47 = vadd.f32 %v1913_v21, %v1030_v43 }
 0x236   :  { %v1098_v50 = vmax.f32 %v1066_v47, 0.0 }
 0x239   :  { %v798_v45 = vpop.f32.mrf.mxu2 }
 0x23a   :  { %v1032_v48 = vadd.f32 %v1031_v44, %v798_v45 }
 0x23c   :  { %v1067_v49 = vadd.f32 %v1913_v21, %v1032_v48 }
 0x23e   :  { %v1099_v46 = vmax.f32 %v1067_v49, 0.0 }
 0x240   :  { %v1651_v51 = vpack.c.bf16 %v1099_v46, %v1098_v50 }
 0x242   :  { %1667 = vst [vmem:[%s2012_s5 + $0x78] sm:$0xff] %v1651_v51  }
 0x243   :  { %1168 = vsyncpa [#allocation3], 1 }
 0x244   :  { %1169 = vsyncpa [#allocation5], 1 }
 0x245   :  { %1170 = vsyncpa [#allocation8], 1 }

// kernel: graphsage_forward_padded.3
= control target key start
LH: loop header
LB: loop body
LE: loop exit
PB: predicated region body
PF: predicated region fallthrough
CT: control target
= control target key end

     0   :  { %10 = vsyncpa [#allocation3], 0  ;;  %s1955_s0 = inlined_call_operand.hbm [shape: bf16[256,256], index: 0, kind: input, shape index: {}]   ;;  %s1956_s1 = inlined_call_operand.hbm [shape: bf16[256,128], index: 1, kind: input, shape index: {}]   ;;  %s1957_s2 = inlined_call_operand.hbm [shape: bf16[128,128], index: 2, kind: input, shape index: {}]   ;;  %s1958_s3 = inlined_call_operand.hbm [shape: bf16[128,128], index: 3, kind: input, shape index: {}]   ;;  %s1959_s4 = inlined_call_operand.hbm [shape: f32[8,128], index: 4, kind: input, shape index: {}]   ;;  %s1960_s5 = inlined_call_operand.vmem [shape: bf16[256,128], index: 5, kind: output, shape index: {}]  }
   0x1   :  { %11 = vsyncpa [#allocation5], 0  ;;  %s30_s20 = sshll.u32 %s1956_s1, 4  ;;  %s31_s20 = int_to_ptr.hbm [resolvable:$true] %s30_s20 }
   0x2   :  { %12 = vsyncpa [#allocation8], 0  ;;  %s1819_s21 = smov [#allocation4]   ;;  %s56_s25 = sshll.u32 %s1958_s3, 4  ;;  %s57_s25 = int_to_ptr.hbm [resolvable:$true] %s56_s25 }
   0x3   :  { %s32_s22 = sshll.u32 %s1819_s21, 4  ;;  %s1820_s26 = smov 64   ;;  %s33_s22 = int_to_ptr.vmem [resolvable:$true] %s32_s22 }
   0x4   :  { %s1821_s27 = smov 4   ;;  %s1822_s28 = smov [#allocation7]  }
   0x5   :  { %38 = dma.hbm_to_vmem [thread:$0]  %s31_s20, 2048, %s33_s22, [#allocation5], %s1820_s26, %s1820_s26, %s1821_s27  }
   0x6   :  { %s58_s29 = sshll.u32 %s1822_s28, 4  ;;  %s17_s7 = sshll.u32 %s1955_s0, 4  ;;  %s59_s29 = int_to_ptr.vmem [resolvable:$true] %s58_s29  ;;  %s18_s7 = int_to_ptr.hbm [resolvable:$true] %s17_s7 }
   0x7   :  { %64 = dma.hbm_to_vmem [thread:$0]  %s57_s25, 1024, %s59_s29, [#allocation8], %s1820_s26, %s1820_s26, %s1821_s27  }
   0x8   :  { %s1823_s1 = smov [#allocation2]   ;;  %s43_s3 = sshll.u32 %s1957_s2, 4  ;;  %s44_s3 = int_to_ptr.hbm [resolvable:$true] %s43_s3 }
   0x9   :  { %s19_s8 = sshll.u32 %s1823_s1, 4  ;;  %s1824_s11 = smov 128   ;;  %s20_s8 = int_to_ptr.vmem [resolvable:$true] %s19_s8 }
   0xa   :  { %s1825_s12 = smov 8   ;;  %s1826_s13 = smov [#allocation6]  }
   0xb   :  { %25 = dma.hbm_to_vmem [thread:$0]  %s18_s7, 4096, %s20_s8, [#allocation3], %s1824_s11, %s1824_s11, %s1825_s12  }
   0xc   :  { %s45_s14 = sshll.u32 %s1826_s13, 4  ;;  %s70_s0 = sshll.u32 %s1959_s4, 4  ;;  %s46_s14 = int_to_ptr.vmem [resolvable:$true] %s45_s14  ;;  %s71_s0 = int_to_ptr.hbm [resolvable:$true] %s70_s0 }
   0xd   :  { %51 = dma.hbm_to_vmem [thread:$0]  %s44_s3, 1024, %s46_s14, [#allocation5], %s1820_s26, %s1820_s26, %s1821_s27  }
   0xe   :  { %s1827_s17 = smov [#allocation9]  }
   0xf   :  { %s72_s18 = sshll.u32 %s1827_s17, 4  ;;  %s73_s18 = int_to_ptr.vmem [resolvable:$true] %s72_s18 }
  0x10   :  { %75 = dma.hbm_to_vmem [thread:$0]  %s71_s0, 128, %s73_s18, [#allocation8]  }
  0x11   :  { %1813 = dma.done.wait [#allocation3], 4096  }
  0x12   :  { %1814 = vsyncadd [#allocation3], 4294963200 }
  0x13   :  { %1815 = dma.done.wait [#allocation5], 3072  }
  0x14   :  { %1816 = vsyncadd [#allocation5], 4294964224 }
  0x15   :  { %1817 = dma.done.wait [#allocation8], 1152  }
  0x16   :  { %1818 = vsyncadd [#allocation8], 4294966144  ;;  %v1563_v0 = vld [vmem:[#allocation4 + $0x38] sm:$0xff]  ;;  %v1562_v2 = vld [vmem:[#allocation4 + $0x30] sm:$0xff] }
  0x17   :  { %v1571_v1 = vld [vmem:[#allocation4 + $0x78] sm:$0xff]  ;;  %453 = vmatpush.bf16.msra.mxu0 %v1563_v0  ;;  %v1570_v3 = vld [vmem:[#allocation4 + $0x70] sm:$0xff]  ;;  %v1561_v4 = vld [vmem:[#allocation4 + $0x28] sm:$0xff] }
  0x18   :  { %542 = vmatpush.bf16.msra.mxu1 %v1571_v1  ;;  %v1569_v5 = vld [vmem:[#allocation4 + $0x68] sm:$0xff]  ;;  %v1560_v6 = vld [vmem:[#allocation4 + $0x20] sm:$0xff]  ;;  %v1559_v8 = vld [vmem:[#allocation4 + $0x18] sm:$0xff] }
  0x19   :  { %v1568_v7 = vld [vmem:[#allocation4 + $0x60] sm:$0xff]  ;;  %v1567_v9 = vld [vmem:[#allocation4 + $0x58] sm:$0xff]  ;;  %v1558_v10 = vld [vmem:[#allocation4 + $0x10] sm:$0xff] }
  0x1a   :  { %v1566_v11 = vld [vmem:[#allocation4 + $0x50] sm:$0xff]  ;;  %v1557_v12 = vld [vmem:[#allocation4 + $0x8] sm:$0xff]  ;;  %v1556_v14 = vld [vmem:[#allocation4] sm:$0xff] }
  0x1b   :  { %454 = vmatpush.bf16.msra.mxu0 %v1562_v2  ;;  %v1565_v13 = vld [vmem:[#allocation4 + $0x48] sm:$0xff]  ;;  %v1564_v15 = vld [vmem:[#allocation4 + $0x40] sm:$0xff]  ;;  %v1198_v22 = vld [vmem:[#allocation2 + $0x10] sm:$0xf] }
  0x1c   :  { %543 = vmatpush.bf16.msra.mxu1 %v1570_v3  ;;  %v1190_v16 = vld [vmem:[#allocation2] sm:$0xf]  ;;  %v1525_v17 = vld [vmem:[#allocation2 + $0x4] sm:$0xf0]  ;;  %v1524_v18 = vld [vmem:[#allocation2 + $0x4] sm:$0xf] }
  0x1d   :  { %v1192_v19 = vld [vmem:[#allocation2 + $0x8] sm:$0xf0]  ;;  %v1191_v20 = vor.u32 %v1525_v17, %v1190_v16  ;;  %v1527_v23 = vld [vmem:[#allocation2 + $0x14] sm:$0xf0]  ;;  %v1526_v24 = vld [vmem:[#allocation2 + $0x14] sm:$0xf] }
  0x1e   :  { %v1195_v21 = vor.u32 %v1524_v18, %v1192_v19  ;;  %v1200_v25 = vld [vmem:[#allocation2 + $0x18] sm:$0xf0]  ;;  %v1199_v26 = vor.u32 %v1527_v23, %v1198_v22  ;;  %v1206_v28 = vld [vmem:[#allocation2 + $0x20] sm:$0xf]  ;;  %v1529_v29 = vld [vmem:[#allocation2 + $0x24] sm:$0xf0] }
  0x1f   :  { %455 = vmatpush.bf16.msra.mxu0 %v1561_v4  ;;  %v1203_v27 = vor.u32 %v1526_v24, %v1200_v25  ;;  %v1528_v30 = vld [vmem:[#allocation2 + $0x24] sm:$0xf]  ;;  %v1208_v31 = vld [vmem:[#allocation2 + $0x28] sm:$0xf0]  ;;  %v1207_v32 = vor.u32 %v1529_v29, %v1206_v28  ;;  %v1214_v34 = vld [vmem:[#allocation2 + $0x30] sm:$0xf] }
  0x20   :  { %544 = vmatpush.bf16.msra.mxu1 %v1569_v5  ;;  %v1211_v33 = vor.u32 %v1528_v30, %v1208_v31  ;;  %v1531_v35 = vld [vmem:[#allocation2 + $0x34] sm:$0xf0]  ;;  %v1530_v36 = vld [vmem:[#allocation2 + $0x34] sm:$0xf]  ;;  %v1216_v37 = vld [vmem:[#allocation2 + $0x38] sm:$0xf0] }
  0x21   :  { %v1215_v38 = vor.u32 %v1531_v35, %v1214_v34  ;;  %v1219_v39 = vor.u32 %v1530_v36, %v1216_v37  ;;  %v1222_v40 = vld [vmem:[#allocation2 + $0x40] sm:$0xf]  ;;  %v1533_v41 = vld [vmem:[#allocation2 + $0x44] sm:$0xf0]  ;;  %v1532_v42 = vld [vmem:[#allocation2 + $0x44] sm:$0xf] }
  0x22   :  { %v1224_v43 = vld [vmem:[#allocation2 + $0x48] sm:$0xf0]  ;;  %v1223_v44 = vor.u32 %v1533_v41, %v1222_v40  ;;  %v1579_v46 = vld [vmem:[#allocation6 + $0x38] sm:$0xff]  ;;  %v1578_v48 = vld [vmem:[#allocation6 + $0x30] sm:$0xff] }
  0x23   :  { %456 = vmatpush.bf16.msra.mxu0 %v1560_v6  ;;  %v1227_v45 = vor.u32 %v1532_v42, %v1224_v43  ;;  %v1587_v47 = vld [vmem:[#allocation7 + $0x38] sm:$0xff]  ;;  %960 = vmatpush.bf16.msra.mxu3 %v1579_v46  ;;  %v1586_v49 = vld [vmem:[#allocation7 + $0x30] sm:$0xff]  ;;  %v1577_v50 = vld [vmem:[#allocation6 + $0x28] sm:$0xff] }
  0x24   :  { %545 = vmatpush.bf16.msra.mxu1 %v1568_v7  ;;  %727 = vmatpush.bf16.msra.mxu2 %v1587_v47  ;;  %v1230_v51 = vld [vmem:[#allocation2 + $0x50] sm:$0xf]  ;;  %v1535_v52 = vld [vmem:[#allocation2 + $0x54] sm:$0xf0]  ;;  %v1534_v53 = vld [vmem:[#allocation2 + $0x54] sm:$0xf] }
  0x25   :  { %v1232_v54 = vld [vmem:[#allocation2 + $0x58] sm:$0xf0]  ;;  %v1576_v55 = vld [vmem:[#allocation6 + $0x20] sm:$0xff]  ;;  %v1231_v56 = vor.u32 %v1535_v52, %v1230_v51  ;;  %v1585_v58 = vld [vmem:[#allocation7 + $0x28] sm:$0xff] }
  0x26   :  { %v1235_v57 = vor.u32 %v1534_v53, %v1232_v54  ;;  %v1575_v59 = vld [vmem:[#allocation6 + $0x18] sm:$0xff]  ;;  %v1584_v60 = vld [vmem:[#allocation7 + $0x20] sm:$0xff]  ;;  %v1574_v61 = vld [vmem:[#allocation6 + $0x10] sm:$0xff] }
  0x27   :  { %457 = vmatpush.bf16.msra.mxu0 %v1559_v8  ;;  %961 = vmatpush.bf16.msra.mxu3 %v1578_v48  ;;  %v1583_v62 = vld [vmem:[#allocation7 + $0x18] sm:$0xff]  ;;  %v1573_v63 = vld [vmem:[#allocation6 + $0x8] sm:$0xff]  ;;  %v1238_v0 = vld [vmem:[#allocation2 + $0x60] sm:$0xf] }
  0x28   :  { %546 = vmatpush.bf16.msra.mxu1 %v1567_v9  ;;  %728 = vmatpush.bf16.msra.mxu2 %v1586_v49  ;;  %v1537_v1 = vld [vmem:[#allocation2 + $0x64] sm:$0xf0]  ;;  %v1536_v2 = vld [vmem:[#allocation2 + $0x64] sm:$0xf]  ;;  %v1240_v3 = vld [vmem:[#allocation2 + $0x68] sm:$0xf0] }
  0x29   :  { %v1239_v4 = vor.u32 %v1537_v1, %v1238_v0  ;;  %v1243_v5 = vor.u32 %v1536_v2, %v1240_v3  ;;  %v1582_v6 = vld [vmem:[#allocation7 + $0x10] sm:$0xff]  ;;  %v1572_v7 = vld [vmem:[#allocation6] sm:$0xff]  ;;  %v1581_v9 = vld [vmem:[#allocation7 + $0x8] sm:$0xff] }
  0x2a   :  { %v1508_v8 = vld [vmem:[#allocation4] sm:$0xff]  ;;  %v1509_v17 = vld [vmem:[#allocation4 + $0x8] sm:$0xff]  ;;  %v1542_v34 = vld [vmem:[#allocation2 + $0x94] sm:$0xf] }
  0x2b   :  { %458 = vmatpush.bf16.msra.mxu0 %v1558_v10  ;;  %962 = vmatpush.bf16.msra.mxu3 %v1577_v50  ;;  %v1580_v10 = vld [vmem:[#allocation7] sm:$0xff]  ;;  %v1541_v19 = vld [vmem:[#allocation2 + $0x84] sm:$0xf0]  ;;  %v1264_v35 = vld [vmem:[#allocation2 + $0x98] sm:$0xf0] }
  0x2c   :  { %547 = vmatpush.bf16.msra.mxu1 %v1566_v11  ;;  %729 = vmatpush.bf16.msra.mxu2 %v1585_v58  ;;  %v1246_v11 = vld [vmem:[#allocation2 + $0x70] sm:$0xf]  ;;  %v1254_v18 = vld [vmem:[#allocation2 + $0x80] sm:$0xf]  ;;  %v1267_v37 = vor.u32 %v1542_v34, %v1264_v35  ;;  %v1511_v40 = vld [vmem:[#allocation4 + $0x18] sm:$0xff] }
  0x2d   :  { %v1255_v22 = vor.u32 %v1541_v19, %v1254_v18  ;;  %v1270_v46 = vld [vmem:[#allocation2 + $0xa0] sm:$0xf]  ;;  %v1545_v47 = vld [vmem:[#allocation2 + $0xa4] sm:$0xf0]  ;;  %v1544_v48 = vld [vmem:[#allocation2 + $0xa4] sm:$0xf] }
  0x2e   :  { %v1272_v49 = vld [vmem:[#allocation2 + $0xa8] sm:$0xf0]  ;;  %v1271_v50 = vor.u32 %v1545_v47, %v1270_v46  ;;  %v1512_v54 = vld [vmem:[#allocation4 + $0x20] sm:$0xff]  ;;  %v1514_v18 = vld [vmem:[#allocation4 + $0x30] sm:$0xff] }
  0x2f   :  { %459 = vmatpush.bf16.msra.mxu0 %v1557_v12  ;;  %963 = vmatpush.bf16.msra.mxu3 %v1576_v55  ;;  %v1539_v12 = vld [vmem:[#allocation2 + $0x74] sm:$0xf0]  ;;  %v1275_v51 = vor.u32 %v1544_v48, %v1272_v49  ;;  %v1516_v46 = vld [vmem:[#allocation4 + $0x40] sm:$0xff] }
  0x30   :  { %548 = vmatpush.bf16.msra.mxu1 %v1565_v13  ;;  %730 = vmatpush.bf16.msra.mxu2 %v1584_v60  ;;  %v1538_v13 = vld [vmem:[#allocation2 + $0x74] sm:$0xf]  ;;  %v1278_v60 = vld [vmem:[#allocation2 + $0xb0] sm:$0xf] }
  0x33   :  { %460 = vmatpush.bf16.msra.mxu0 %v1556_v14  ;;  %964 = vmatpush.bf16.msra.mxu3 %v1575_v59  ;;  %v1248_v14 = vld [vmem:[#allocation2 + $0x78] sm:$0xf0] }
  0x34   :  { %549 = vmatpush.bf16.msra.mxu1 %v1564_v15  ;;  %731 = vmatpush.bf16.msra.mxu2 %v1583_v62  ;;  %v1247_v15 = vor.u32 %v1539_v12, %v1246_v11  ;;  %v1251_v16 = vor.u32 %v1538_v13, %v1248_v14  ;;  %v1546_v62 = vld [vmem:[#allocation2 + $0xb4] sm:$0xf]  ;;  %v1549_v11 = vld [vmem:[#allocation2 + $0xc4] sm:$0xf0]  ;;  %v1548_v12 = vld [vmem:[#allocation2 + $0xc4] sm:$0xf] }
  0x35   :  { %v1288_v13 = vld [vmem:[#allocation2 + $0xc8] sm:$0xf0] }
  0x36   :  { %461 = vmatmul.bf16.vlgmr.msra.gmra.mxu0 %v1191_v20  ;;  %v1540_v20 = vld [vmem:[#allocation2 + $0x84] sm:$0xf] }
  0x37   :  { %550 = vmatmul.bf16.vlgmr.msra.gmra.mxu1 %v1195_v21  ;;  %965 = vmatpush.bf16.msra.mxu3 %v1574_v61  ;;  %v1256_v21 = vld [vmem:[#allocation2 + $0x88] sm:$0xf0]  ;;  %v1547_v61 = vld [vmem:[#allocation2 + $0xb4] sm:$0xf0] }
  0x38   :  { %732 = vmatpush.bf16.msra.mxu2 %v1582_v6  ;;  %v1259_v23 = vor.u32 %v1540_v20, %v1256_v21  ;;  %v1279_v0 = vor.u32 %v1547_v61, %v1278_v60 }
  0x3b   :  { %966 = vmatpush.bf16.msra.mxu3 %v1573_v63  ;;  %v1280_v63 = vld [vmem:[#allocation2 + $0xb8] sm:$0xf0] }
  0x3c   :  { %733 = vmatpush.bf16.msra.mxu2 %v1581_v9  ;;  %v1283_v1 = vor.u32 %v1546_v62, %v1280_v63  ;;  %v1517_v62 = vld [vmem:[#allocation4 + $0x48] sm:$0xff] }
  0x3f   :  { %967 = vmatpush.bf16.msra.mxu3 %v1572_v7 }
  0x40   :  { %734 = vmatpush.bf16.msra.mxu2 %v1580_v10  ;;  %v1286_v10 = vld [vmem:[#allocation2 + $0xc0] sm:$0xf] }
  0x41   :  { %v1287_v14 = vor.u32 %v1549_v11, %v1286_v10 }
  0x42   :  { %968 = vmatmul.bf16.vlgmr.msra.gmra.mxu3 %v1508_v8 }
  0x46   :  { %466 = vmatmul.bf16.gmra.mxu0 %v1199_v26  ;;  %v1510_v26 = vld [vmem:[#allocation4 + $0x10] sm:$0xff] }
  0x47   :  { %555 = vmatmul.bf16.gmra.mxu1 %v1203_v27 }
  0x52   :  { %973 = vmatmul.bf16.gmra.mxu3 %v1509_v17 }
  0x56   :  { %471 = vmatmul.bf16.gmra.mxu0 %v1207_v32  ;;  %v1262_v32 = vld [vmem:[#allocation2 + $0x90] sm:$0xf] }
  0x57   :  { %560 = vmatmul.bf16.gmra.mxu1 %v1211_v33  ;;  %v1543_v33 = vld [vmem:[#allocation2 + $0x94] sm:$0xf0] }
  0x58   :  { %v1263_v36 = vor.u32 %v1543_v33, %v1262_v32  ;;  %v1515_v32 = vld [vmem:[#allocation4 + $0x38] sm:$0xff] }
  0x62   :  { %978 = vmatmul.bf16.gmra.mxu3 %v1510_v26  ;;  %v1550_v26 = vld [vmem:[#allocation2 + $0xd4] sm:$0xf] }
  0x66   :  { %476 = vmatmul.bf16.gmra.mxu0 %v1215_v38 }
  0x67   :  { %565 = vmatmul.bf16.gmra.mxu1 %v1219_v39 }
  0x72   :  { %983 = vmatmul.bf16.gmra.mxu3 %v1511_v40  ;;  %v1552_v40 = vld [vmem:[#allocation2 + $0xe4] sm:$0xf] }
  0x76   :  { %481 = vmatmul.bf16.gmra.mxu0 %v1223_v44 }
  0x77   :  { %570 = vmatmul.bf16.gmra.mxu1 %v1227_v45 }
  0x82   :  { %988 = vmatmul.bf16.gmra.mxu3 %v1512_v54  ;;  %v1555_v54 = vld [vmem:[#allocation2 + $0xf4] sm:$0xf0] }
  0x86   :  { %486 = vmatmul.bf16.gmra.mxu0 %v1231_v56 }
  0x87   :  { %575 = vmatmul.bf16.gmra.mxu1 %v1235_v57 }
  0x96   :  { %491 = vmatmul.bf16.gmra.mxu0 %v1239_v4  ;;  %v1513_v4 = vld [vmem:[#allocation4 + $0x28] sm:$0xff] }
  0x97   :  { %580 = vmatmul.bf16.gmra.mxu1 %v1243_v5  ;;  %993 = vmatmul.bf16.gmra.mxu3 %v1513_v4 }
  0xa6   :  { %496 = vmatmul.bf16.gmra.mxu0 %v1247_v15  ;;  %v1291_v15 = vor.u32 %v1548_v12, %v1288_v13 }
  0xa7   :  { %585 = vmatmul.bf16.gmra.mxu1 %v1251_v16  ;;  %998 = vmatmul.bf16.gmra.mxu3 %v1514_v18 }
  0xb3   :  { %v462_v24 = vpop.f32.mrf.mxu0 }
  0xb4   :  { %v551_v25 = vpop.f32.mrf.mxu1 }
  0xb5   :  { %v552_v29 = vadd.f32 %v551_v25, %v462_v24  ;;  %v1294_v24 = vld [vmem:[#allocation2 + $0xd0] sm:$0xf]  ;;  %v1551_v25 = vld [vmem:[#allocation2 + $0xd4] sm:$0xf0] }
  0xb6   :  { %501 = vmatmul.bf16.gmra.mxu0 %v1255_v22 }
  0xb7   :  { %590 = vmatmul.bf16.gmra.mxu1 %v1259_v23  ;;  %1003 = vmatmul.bf16.gmra.mxu3 %v1515_v32 }
  0xbb   :  { %v464_v27 = vpop.f32.mrf.mxu0 }
  0xbc   :  { %v553_v28 = vpop.f32.mrf.mxu1 }
  0xbd   :  { %v554_v30 = vadd.f32 %v553_v28, %v464_v27  ;;  %v1296_v27 = vld [vmem:[#allocation2 + $0xd8] sm:$0xf0]  ;;  %v1295_v28 = vor.u32 %v1551_v25, %v1294_v24 }
  0xbf   :  { %v647_v31 = vpack.c.bf16 %v554_v30, %v552_v29  ;;  %v1299_v29 = vor.u32 %v1550_v26, %v1296_v27 }
  0xc1   :  { %735 = vmatmul.bf16.vlgmr.msra.gmra.mxu2 %v647_v31 }
  0xc3   :  { %v467_v38 = vpop.f32.mrf.mxu0 }
  0xc4   :  { %v556_v39 = vpop.f32.mrf.mxu1 }
  0xc5   :  { %v557_v43 = vadd.f32 %v556_v39, %v467_v38  ;;  %v1302_v38 = vld [vmem:[#allocation2 + $0xe0] sm:$0xf]  ;;  %v1553_v39 = vld [vmem:[#allocation2 + $0xe4] sm:$0xf0] }
  0xc6   :  { %506 = vmatmul.bf16.gmra.mxu0 %v1263_v36 }
  0xc7   :  { %595 = vmatmul.bf16.gmra.mxu1 %v1267_v37  ;;  %1008 = vmatmul.bf16.gmra.mxu3 %v1516_v46 }
  0xcb   :  { %v469_v41 = vpop.f32.mrf.mxu0 }
  0xcc   :  { %v558_v42 = vpop.f32.mrf.mxu1 }
  0xcd   :  { %v559_v44 = vadd.f32 %v558_v42, %v469_v41  ;;  %v1304_v41 = vld [vmem:[#allocation2 + $0xe8] sm:$0xf0]  ;;  %v1303_v42 = vor.u32 %v1553_v39, %v1302_v38  ;;  %v1520_v39 = vld [vmem:[#allocation4 + $0x60] sm:$0xff] }
  0xcf   :  { %v648_v45 = vpack.c.bf16 %v559_v44, %v557_v43  ;;  %v1307_v43 = vor.u32 %v1552_v40, %v1304_v41 }
  0xd1   :  { %740 = vmatmul.bf16.gmra.mxu2 %v648_v45 }
  0xd3   :  { %v472_v52 = vpop.f32.mrf.mxu0 }
  0xd4   :  { %v561_v53 = vpop.f32.mrf.mxu1 }
  0xd5   :  { %v562_v57 = vadd.f32 %v561_v53, %v472_v52  ;;  %v1310_v53 = vld [vmem:[#allocation2 + $0xf0] sm:$0xf] }
  0xd6   :  { %511 = vmatmul.bf16.gmra.mxu0 %v1271_v50 }
  0xd7   :  { %600 = vmatmul.bf16.gmra.mxu1 %v1275_v51  ;;  %v969_v51 = vpop.f32.mrf.mxu3  ;;  %1013 = vmatmul.bf16.gmra.mxu3 %v1517_v62 }
  0xdb   :  { %v474_v55 = vpop.f32.mrf.mxu0 }
  0xdc   :  { %v563_v56 = vpop.f32.mrf.mxu1 }
  0xdd   :  { %v564_v58 = vadd.f32 %v563_v56, %v474_v55  ;;  %v1554_v55 = vld [vmem:[#allocation2 + $0xf4] sm:$0xf]  ;;  %v1312_v56 = vld [vmem:[#allocation2 + $0xf8] sm:$0xf0] }
  0xdf   :  { %v649_v59 = vpack.c.bf16 %v564_v58, %v562_v57  ;;  %v1311_v57 = vor.u32 %v1555_v54, %v1310_v53  ;;  %v1315_v58 = vor.u32 %v1554_v55, %v1312_v56  ;;  %v971_v61 = vpop.f32.mrf.mxu3 }
  0xe1   :  { %745 = vmatmul.bf16.gmra.mxu2 %v649_v59 }
  0xe3   :  { %v477_v2 = vpop.f32.mrf.mxu0 }
  0xe4   :  { %v566_v3 = vpop.f32.mrf.mxu1 }
  0xe5   :  { %v567_v7 = vadd.f32 %v566_v3, %v477_v2 }
  0xe6   :  { %516 = vmatmul.bf16.gmra.mxu0 %v1279_v0 }
  0xe7   :  { %605 = vmatmul.bf16.gmra.mxu1 %v1283_v1  ;;  %v974_v3 = vpop.f32.mrf.mxu3 }
  0xeb   :  { %v479_v5 = vpop.f32.mrf.mxu0 }
  0xec   :  { %v568_v6 = vpop.f32.mrf.mxu1 }
  0xed   :  { %v569_v8 = vadd.f32 %v568_v6, %v479_v5 }
  0xef   :  { %v650_v9 = vpack.c.bf16 %v569_v8, %v567_v7  ;;  %v976_v7 = vpop.f32.mrf.mxu3  ;;  %v1518_v8 = vld [vmem:[#allocation4 + $0x50] sm:$0xff] }
  0xf0   :  { %1018 = vmatmul.bf16.gmra.mxu3 %v1518_v8 }
  0xf1   :  { %750 = vmatmul.bf16.gmra.mxu2 %v650_v9 }
  0xf3   :  { %v482_v16 = vpop.f32.mrf.mxu0 }
  0xf4   :  { %v571_v17 = vpop.f32.mrf.mxu1 }
  0xf5   :  { %v572_v21 = vadd.f32 %v571_v17, %v482_v16 }
  0xf6   :  { %521 = vmatmul.bf16.gmra.mxu0 %v1287_v14 }
  0xf7   :  { %610 = vmatmul.bf16.gmra.mxu1 %v1291_v15  ;;  %v979_v13 = vpop.f32.mrf.mxu3 }
  0xfb   :  { %v484_v19 = vpop.f32.mrf.mxu0 }
  0xfc   :  { %v573_v20 = vpop.f32.mrf.mxu1 }
  0xfd   :  { %v574_v22 = vadd.f32 %v573_v20, %v484_v19  ;;  %v1519_v19 = vld [vmem:[#allocation4 + $0x58] sm:$0xff] }
  0xff   :  { %v651_v23 = vpack.c.bf16 %v574_v22, %v572_v21  ;;  %v981_v18 = vpop.f32.mrf.mxu3  ;;  %v1873_v21 = vld [vmem:[#allocation9] ss:$0 sm:$0xff] }
 0x100   :  { %1023 = vmatmul.bf16.gmra.mxu3 %v1519_v19 }
 0x101   :  { %755 = vmatmul.bf16.gmra.mxu2 %v651_v23 }
 0x103   :  { %v487_v30 = vpop.f32.mrf.mxu0 }
 0x104   :  { %v576_v31 = vpop.f32.mrf.mxu1 }
 0x105   :  { %v577_v35 = vadd.f32 %v576_v31, %v487_v30 }
 0x106   :  { %526 = vmatmul.bf16.gmra.mxu0 %v1295_v28 }
 0x107   :  { %615 = vmatmul.bf16.gmra.mxu1 %v1299_v29  ;;  %v984_v27 = vpop.f32.mrf.mxu3 }
 0x10b   :  { %v489_v33 = vpop.f32.mrf.mxu0 }
 0x10c   :  { %v578_v34 = vpop.f32.mrf.mxu1 }
 0x10d   :  { %v579_v36 = vadd.f32 %v578_v34, %v489_v33 }
 0x10f   :  { %v652_v37 = vpack.c.bf16 %v579_v36, %v577_v35  ;;  %v986_v38 = vpop.f32.mrf.mxu3 }
 0x110   :  { %1028 = vmatmul.bf16.gmra.mxu3 %v1520_v39 }
 0x111   :  { %760 = vmatmul.bf16.gmra.mxu2 %v652_v37 }
 0x113   :  { %v492_v44 = vpop.f32.mrf.mxu0 }
 0x114   :  { %v581_v45 = vpop.f32.mrf.mxu1 }
 0x115   :  { %v582_v49 = vadd.f32 %v581_v45, %v492_v44 }
 0x116   :  { %531 = vmatmul.bf16.gmra.mxu0 %v1303_v42 }
 0x117   :  { %620 = vmatmul.bf16.gmra.mxu1 %v1307_v43  ;;  %v989_v46 = vpop.f32.mrf.mxu3 }
 0x11b   :  { %v494_v47 = vpop.f32.mrf.mxu0 }
 0x11c   :  { %v583_v48 = vpop.f32.mrf.mxu1 }
 0x11d   :  { %v584_v50 = vadd.f32 %v583_v48, %v494_v47 }
 0x11f   :  { %v653_v52 = vpack.c.bf16 %v584_v50, %v582_v49 }
 0x121   :  { %765 = vmatmul.bf16.gmra.mxu2 %v653_v52 }
 0x123   :  { %v497_v59 = vpop.f32.mrf.mxu0 }
 0x124   :  { %v586_v60 = vpop.f32.mrf.mxu1 }
 0x125   :  { %v587_v1 = vadd.f32 %v586_v60, %v497_v59 }
 0x126   :  { %536 = vmatmul.bf16.gmra.mxu0 %v1311_v57  ;;  %v991_v57 = vpop.f32.mrf.mxu3 }
 0x127   :  { %625 = vmatmul.bf16.gmra.mxu1 %v1315_v58  ;;  %v1521_v58 = vld [vmem:[#allocation4 + $0x68] sm:$0xff] }
 0x128   :  { %1033 = vmatmul.bf16.gmra.mxu3 %v1521_v58 }
 0x12b   :  { %v499_v63 = vpop.f32.mrf.mxu0 }
 0x12c   :  { %v588_v0 = vpop.f32.mrf.mxu1 }
 0x12d   :  { %v589_v2 = vadd.f32 %v588_v0, %v499_v63 }
 0x12f   :  { %v654_v4 = vpack.c.bf16 %v589_v2, %v587_v1  ;;  %v994_v1 = vpop.f32.mrf.mxu3 }
 0x131   :  { %770 = vmatmul.bf16.gmra.mxu2 %v654_v4 }
 0x133   :  { %v502_v5 = vpop.f32.mrf.mxu0 }
 0x134   :  { %v591_v6 = vpop.f32.mrf.mxu1 }
 0x135   :  { %v592_v11 = vadd.f32 %v591_v6, %v502_v5 }
 0x13b   :  { %v504_v9 = vpop.f32.mrf.mxu0 }
 0x13c   :  { %v593_v10 = vpop.f32.mrf.mxu1 }
 0x13d   :  { %v594_v12 = vadd.f32 %v593_v10, %v504_v9 }
 0x13f   :  { %v655_v14 = vpack.c.bf16 %v594_v12, %v592_v11  ;;  %v996_v12 = vpop.f32.mrf.mxu3 }
 0x141   :  { %775 = vmatmul.bf16.gmra.mxu2 %v655_v14 }
 0x143   :  { %v507_v15 = vpop.f32.mrf.mxu0 }
 0x144   :  { %v596_v16 = vpop.f32.mrf.mxu1  ;;  %v736_v17 = vpop.f32.mrf.mxu2 }
 0x145   :  { %v970_v20 = vadd.f32 %v969_v51, %v736_v17  ;;  %v597_v24 = vadd.f32 %v596_v16, %v507_v15 }
 0x147   :  { %v1051_v28 = vadd.f32 %v1873_v21, %v970_v20 }
 0x149   :  { %v1083_v32 = vmax.f32 %v1051_v28, 0.0 }
 0x14b   :  { %v509_v22 = vpop.f32.mrf.mxu0 }
 0x14c   :  { %v598_v23 = vpop.f32.mrf.mxu1  ;;  %v738_v26 = vpop.f32.mrf.mxu2 }
 0x14d   :  { %v599_v25 = vadd.f32 %v598_v23, %v509_v22  ;;  %v972_v29 = vadd.f32 %v971_v61, %v738_v26 }
 0x14f   :  { %v656_v30 = vpack.c.bf16 %v599_v25, %v597_v24  ;;  %v1052_v31 = vadd.f32 %v1873_v21, %v972_v29  ;;  %v999_v24 = vpop.f32.mrf.mxu3 }
 0x151   :  { %780 = vmatmul.bf16.gmra.mxu2 %v656_v30  ;;  %v1084_v33 = vmax.f32 %v1052_v31, 0.0 }
 0x153   :  { %v1591_v34 = vpack.c.bf16 %v1084_v33, %v1083_v32  ;;  %v512_v35 = vpop.f32.mrf.mxu0  ;;  %v1523_v32 = vld [vmem:[#allocation4 + $0x78] sm:$0xff] }
 0x154   :  { %v601_v36 = vpop.f32.mrf.mxu1  ;;  %v741_v37 = vpop.f32.mrf.mxu2 }
 0x155   :  { %1592 = vst [vmem:[%s1960_s5] sm:$0xff] %v1591_v34   ;;  %v975_v40 = vadd.f32 %v974_v3, %v741_v37  ;;  %v602_v43 = vadd.f32 %v601_v36, %v512_v35 }
 0x157   :  { %v1053_v47 = vadd.f32 %v1873_v21, %v975_v40  ;;  %v1001_v33 = vpop.f32.mrf.mxu3 }
 0x159   :  { %v1085_v51 = vmax.f32 %v1053_v47, 0.0 }
 0x15b   :  { %v514_v41 = vpop.f32.mrf.mxu0 }
 0x15c   :  { %v603_v42 = vpop.f32.mrf.mxu1  ;;  %v743_v45 = vpop.f32.mrf.mxu2 }
 0x15d   :  { %v604_v44 = vadd.f32 %v603_v42, %v514_v41  ;;  %v977_v48 = vadd.f32 %v976_v7, %v743_v45 }
 0x15f   :  { %v657_v49 = vpack.c.bf16 %v604_v44, %v602_v43  ;;  %v1054_v50 = vadd.f32 %v1873_v21, %v977_v48  ;;  %v1004_v47 = vpop.f32.mrf.mxu3 }
 0x161   :  { %785 = vmatmul.bf16.gmra.mxu2 %v657_v49  ;;  %v1086_v52 = vmax.f32 %v1054_v50, 0.0 }
 0x163   :  { %v1596_v53 = vpack.c.bf16 %v1086_v52, %v1085_v51  ;;  %v517_v54 = vpop.f32.mrf.mxu0 }
 0x164   :  { %v606_v55 = vpop.f32.mrf.mxu1  ;;  %v746_v56 = vpop.f32.mrf.mxu2 }
 0x165   :  { %1668 = vst [vmem:[%s1960_s5 + $0x8] sm:$0xff] %v1596_v53   ;;  %v980_v59 = vadd.f32 %v979_v13, %v746_v56  ;;  %v607_v62 = vadd.f32 %v606_v55, %v517_v54  ;;  %v1522_v13 = vld [vmem:[#allocation4 + $0x70] sm:$0xff] }
 0x166   :  { %1038 = vmatmul.bf16.gmra.mxu3 %v1522_v13 }
 0x167   :  { %v1055_v2 = vadd.f32 %v1873_v21, %v980_v59 }
 0x169   :  { %v1087_v6 = vmax.f32 %v1055_v2, 0.0 }
 0x16b   :  { %v519_v60 = vpop.f32.mrf.mxu0 }
 0x16c   :  { %v608_v61 = vpop.f32.mrf.mxu1  ;;  %v748_v0 = vpop.f32.mrf.mxu2 }
 0x16d   :  { %v609_v63 = vadd.f32 %v608_v61, %v519_v60  ;;  %v982_v3 = vadd.f32 %v981_v18, %v748_v0 }
 0x16f   :  { %v658_v4 = vpack.c.bf16 %v609_v63, %v607_v62  ;;  %v1056_v5 = vadd.f32 %v1873_v21, %v982_v3 }
 0x171   :  { %790 = vmatmul.bf16.gmra.mxu2 %v658_v4  ;;  %v1088_v7 = vmax.f32 %v1056_v5, 0.0 }
 0x173   :  { %v1601_v8 = vpack.c.bf16 %v1088_v7, %v1087_v6  ;;  %v522_v9 = vpop.f32.mrf.mxu0 }
 0x174   :  { %v611_v10 = vpop.f32.mrf.mxu1  ;;  %v751_v11 = vpop.f32.mrf.mxu2 }
 0x175   :  { %1669 = vst [vmem:[%s1960_s5 + $0x10] sm:$0xff] %v1601_v8   ;;  %v985_v14 = vadd.f32 %v984_v27, %v751_v11  ;;  %v612_v17 = vadd.f32 %v611_v10, %v522_v9 }
 0x176   :  { %1043 = vmatmul.bf16.gmra.mxu3 %v1523_v32 }
 0x177   :  { %v1057_v20 = vadd.f32 %v1873_v21, %v985_v14 }
 0x179   :  { %v1089_v26 = vmax.f32 %v1057_v20, 0.0 }
 0x17b   :  { %v524_v15 = vpop.f32.mrf.mxu0 }
 0x17c   :  { %v613_v16 = vpop.f32.mrf.mxu1  ;;  %v753_v19 = vpop.f32.mrf.mxu2 }
 0x17d   :  { %v614_v18 = vadd.f32 %v613_v16, %v524_v15  ;;  %v987_v22 = vadd.f32 %v986_v38, %v753_v19 }
 0x17f   :  { %v659_v23 = vpack.c.bf16 %v614_v18, %v612_v17  ;;  %v1058_v25 = vadd.f32 %v1873_v21, %v987_v22 }
 0x181   :  { %795 = vmatmul.bf16.gmra.mxu2 %v659_v23  ;;  %v1090_v28 = vmax.f32 %v1058_v25, 0.0 }
 0x183   :  { %v1606_v29 = vpack.c.bf16 %v1090_v28, %v1089_v26  ;;  %v527_v30 = vpop.f32.mrf.mxu0 }
 0x184   :  { %v616_v31 = vpop.f32.mrf.mxu1  ;;  %v756_v27 = vpop.f32.mrf.mxu2 }
 0x185   :  { %1670 = vst [vmem:[%s1960_s5 + $0x18] sm:$0xff] %v1606_v29   ;;  %v990_v34 = vadd.f32 %v989_v46, %v756_v27  ;;  %v617_v37 = vadd.f32 %v616_v31, %v527_v30 }
 0x187   :  { %v1059_v40 = vadd.f32 %v1873_v21, %v990_v34 }
 0x189   :  { %v1091_v44 = vmax.f32 %v1059_v40, 0.0 }
 0x18b   :  { %v529_v35 = vpop.f32.mrf.mxu0 }
 0x18c   :  { %v618_v36 = vpop.f32.mrf.mxu1  ;;  %v758_v39 = vpop.f32.mrf.mxu2 }
 0x18d   :  { %v619_v38 = vadd.f32 %v618_v36, %v529_v35  ;;  %v992_v41 = vadd.f32 %v991_v57, %v758_v39  ;;  %v1006_v57 = vpop.f32.mrf.mxu3 }
 0x18f   :  { %v660_v42 = vpack.c.bf16 %v619_v38, %v617_v37  ;;  %v1060_v43 = vadd.f32 %v1873_v21, %v992_v41 }
 0x191   :  { %800 = vmatmul.bf16.gmra.mxu2 %v660_v42  ;;  %v1092_v45 = vmax.f32 %v1060_v43, 0.0 }
 0x193   :  { %v1611_v48 = vpack.c.bf16 %v1092_v45, %v1091_v44  ;;  %v532_v49 = vpop.f32.mrf.mxu0 }
 0x194   :  { %v621_v50 = vpop.f32.mrf.mxu1  ;;  %v761_v46 = vpop.f32.mrf.mxu2 }
 0x195   :  { %1671 = vst [vmem:[%s1960_s5 + $0x20] sm:$0xff] %v1611_v48   ;;  %v995_v51 = vadd.f32 %v994_v1, %v761_v46  ;;  %v622_v54 = vadd.f32 %v621_v50, %v532_v49  ;;  %v1009_v1 = vpop.f32.mrf.mxu3 }
 0x197   :  { %v1061_v58 = vadd.f32 %v1873_v21, %v995_v51 }
 0x199   :  { %v1093_v62 = vmax.f32 %v1061_v58, 0.0 }
 0x19b   :  { %v534_v52 = vpop.f32.mrf.mxu0 }
 0x19c   :  { %v623_v53 = vpop.f32.mrf.mxu1  ;;  %v763_v56 = vpop.f32.mrf.mxu2 }
 0x19d   :  { %v624_v55 = vadd.f32 %v623_v53, %v534_v52  ;;  %v997_v59 = vadd.f32 %v996_v12, %v763_v56  ;;  %v1011_v15 = vpop.f32.mrf.mxu3 }
 0x19f   :  { %v661_v60 = vpack.c.bf16 %v624_v55, %v622_v54  ;;  %v1062_v61 = vadd.f32 %v1873_v21, %v997_v59 }
 0x1a1   :  { %805 = vmatmul.bf16.gmra.mxu2 %v661_v60  ;;  %v1094_v63 = vmax.f32 %v1062_v61, 0.0 }
 0x1a3   :  { %v1616_v0 = vpack.c.bf16 %v1094_v63, %v1093_v62  ;;  %v537_v2 = vpop.f32.mrf.mxu0 }
 0x1a4   :  { %v626_v3 = vpop.f32.mrf.mxu1  ;;  %v766_v4 = vpop.f32.mrf.mxu2 }
 0x1a5   :  { %1672 = vst [vmem:[%s1960_s5 + $0x28] sm:$0xff] %v1616_v0   ;;  %v1000_v5 = vadd.f32 %v999_v24, %v766_v4  ;;  %v627_v8 = vadd.f32 %v626_v3, %v537_v2  ;;  %v1014_v22 = vpop.f32.mrf.mxu3 }
 0x1a7   :  { %v1063_v11 = vadd.f32 %v1873_v21, %v1000_v5 }
 0x1a9   :  { %v1095_v16 = vmax.f32 %v1063_v11, 0.0 }
 0x1ab   :  { %v539_v6 = vpop.f32.mrf.mxu0 }
 0x1ac   :  { %v628_v7 = vpop.f32.mrf.mxu1  ;;  %v768_v10 = vpop.f32.mrf.mxu2 }
 0x1ad   :  { %v629_v9 = vadd.f32 %v628_v7, %v539_v6  ;;  %v1002_v12 = vadd.f32 %v1001_v33, %v768_v10  ;;  %v1016_v27 = vpop.f32.mrf.mxu3 }
 0x1af   :  { %v662_v13 = vpack.c.bf16 %v629_v9, %v627_v8  ;;  %v1064_v14 = vadd.f32 %v1873_v21, %v1002_v12 }
 0x1b1   :  { %810 = vmatmul.bf16.gmra.mxu2 %v662_v13  ;;  %v1096_v17 = vmax.f32 %v1064_v14, 0.0 }
 0x1b3   :  { %v1621_v18 = vpack.c.bf16 %v1096_v17, %v1095_v16 }
 0x1b4   :  { %v771_v19 = vpop.f32.mrf.mxu2 }
 0x1b5   :  { %1673 = vst [vmem:[%s1960_s5 + $0x30] sm:$0xff] %v1621_v18   ;;  %v1005_v20 = vadd.f32 %v1004_v47, %v771_v19  ;;  %v1019_v36 = vpop.f32.mrf.mxu3 }
 0x1b7   :  { %v1065_v24 = vadd.f32 %v1873_v21, %v1005_v20 }
 0x1b9   :  { %v1097_v28 = vmax.f32 %v1065_v24, 0.0 }
 0x1bc   :  { %v773_v23 = vpop.f32.mrf.mxu2 }
 0x1bd   :  { %v1007_v25 = vadd.f32 %v1006_v57, %v773_v23  ;;  %v1021_v42 = vpop.f32.mrf.mxu3 }
 0x1bf   :  { %v1066_v26 = vadd.f32 %v1873_v21, %v1007_v25 }
 0x1c1   :  { %v1098_v29 = vmax.f32 %v1066_v26, 0.0 }
 0x1c3   :  { %v1626_v30 = vpack.c.bf16 %v1098_v29, %v1097_v28 }
 0x1c4   :  { %v776_v31 = vpop.f32.mrf.mxu2 }
 0x1c5   :  { %1674 = vst [vmem:[%s1960_s5 + $0x38] sm:$0xff] %v1626_v30   ;;  %v1010_v32 = vadd.f32 %v1009_v1, %v776_v31  ;;  %v1024_v46 = vpop.f32.mrf.mxu3 }
 0x1c7   :  { %v1067_v34 = vadd.f32 %v1873_v21, %v1010_v32 }
 0x1c9   :  { %v1099_v38 = vmax.f32 %v1067_v34, 0.0 }
 0x1cc   :  { %v778_v33 = vpop.f32.mrf.mxu2 }
 0x1cd   :  { %v1012_v35 = vadd.f32 %v1011_v15, %v778_v33  ;;  %v1026_v55 = vpop.f32.mrf.mxu3 }
 0x1cf   :  { %v1068_v37 = vadd.f32 %v1873_v21, %v1012_v35 }
 0x1d1   :  { %v1100_v39 = vmax.f32 %v1068_v37, 0.0 }
 0x1d3   :  { %v1631_v40 = vpack.c.bf16 %v1100_v39, %v1099_v38 }
 0x1d4   :  { %v781_v41 = vpop.f32.mrf.mxu2 }
 0x1d5   :  { %1675 = vst [vmem:[%s1960_s5 + $0x40] sm:$0xff] %v1631_v40   ;;  %v1015_v43 = vadd.f32 %v1014_v22, %v781_v41  ;;  %v1029_v63 = vpop.f32.mrf.mxu3 }
 0x1d7   :  { %v1069_v45 = vadd.f32 %v1873_v21, %v1015_v43 }
 0x1d9   :  { %v1101_v49 = vmax.f32 %v1069_v45, 0.0 }
 0x1dc   :  { %v783_v44 = vpop.f32.mrf.mxu2 }
 0x1dd   :  { %v1017_v47 = vadd.f32 %v1016_v27, %v783_v44  ;;  %v1031_v5 = vpop.f32.mrf.mxu3 }
 0x1df   :  { %v1070_v48 = vadd.f32 %v1873_v21, %v1017_v47 }
 0x1e1   :  { %v1102_v50 = vmax.f32 %v1070_v48, 0.0 }
 0x1e3   :  { %v1636_v51 = vpack.c.bf16 %v1102_v50, %v1101_v49 }
 0x1e4   :  { %v786_v52 = vpop.f32.mrf.mxu2 }
 0x1e5   :  { %1676 = vst [vmem:[%s1960_s5 + $0x48] sm:$0xff] %v1636_v51   ;;  %v1020_v53 = vadd.f32 %v1019_v36, %v786_v52  ;;  %v1034_v11 = vpop.f32.mrf.mxu3 }
 0x1e7   :  { %v1071_v56 = vadd.f32 %v1873_v21, %v1020_v53 }
 0x1e9   :  { %v1103_v59 = vmax.f32 %v1071_v56, 0.0 }
 0x1ec   :  { %v788_v54 = vpop.f32.mrf.mxu2 }
 0x1ed   :  { %v1022_v57 = vadd.f32 %v1021_v42, %v788_v54  ;;  %v1036_v20 = vpop.f32.mrf.mxu3 }
 0x1ef   :  { %v1072_v58 = vadd.f32 %v1873_v21, %v1022_v57 }
 0x1f1   :  { %v1104_v60 = vmax.f32 %v1072_v58, 0.0 }
 0x1f3   :  { %v1641_v61 = vpack.c.bf16 %v1104_v60, %v1103_v59 }
 0x1f4   :  { %v791_v62 = vpop.f32.mrf.mxu2 }
 0x1f5   :  { %1677 = vst [vmem:[%s1960_s5 + $0x50] sm:$0xff] %v1641_v61   ;;  %v1025_v0 = vadd.f32 %v1024_v46, %v791_v62  ;;  %v1039_v26 = vpop.f32.mrf.mxu3 }
 0x1f7   :  { %v1073_v3 = vadd.f32 %v1873_v21, %v1025_v0 }
 0x1f9   :  { %v1105_v6 = vmax.f32 %v1073_v3, 0.0 }
 0x1fc   :  { %v793_v2 = vpop.f32.mrf.mxu2 }
 0x1fd   :  { %v1027_v4 = vadd.f32 %v1026_v55, %v793_v2  ;;  %v1041_v32 = vpop.f32.mrf.mxu3 }
 0x1ff   :  { %v1074_v1 = vadd.f32 %v1873_v21, %v1027_v4 }
 0x201   :  { %v1106_v7 = vmax.f32 %v1074_v1, 0.0 }
 0x203   :  { %v1646_v8 = vpack.c.bf16 %v1106_v7, %v1105_v6 }
 0x204   :  { %v796_v9 = vpop.f32.mrf.mxu2 }
 0x205   :  { %1678 = vst [vmem:[%s1960_s5 + $0x58] sm:$0xff] %v1646_v8   ;;  %v1030_v10 = vadd.f32 %v1029_v63, %v796_v9  ;;  %v1044_v40 = vpop.f32.mrf.mxu3 }
 0x207   :  { %v1075_v13 = vadd.f32 %v1873_v21, %v1030_v10 }
 0x209   :  { %v1107_v16 = vmax.f32 %v1075_v13, 0.0 }
 0x20c   :  { %v798_v12 = vpop.f32.mrf.mxu2 }
 0x20d   :  { %v1032_v14 = vadd.f32 %v1031_v5, %v798_v12  ;;  %v1046_v44 = vpop.f32.mrf.mxu3 }
 0x20f   :  { %v1076_v15 = vadd.f32 %v1873_v21, %v1032_v14 }
 0x211   :  { %v1108_v17 = vmax.f32 %v1076_v15, 0.0 }
 0x213   :  { %v1651_v18 = vpack.c.bf16 %v1108_v17, %v1107_v16 }
 0x214   :  { %v801_v19 = vpop.f32.mrf.mxu2 }
 0x215   :  { %1679 = vst [vmem:[%s1960_s5 + $0x60] sm:$0xff] %v1651_v18   ;;  %v1035_v22 = vadd.f32 %v1034_v11, %v801_v19 }
 0x217   :  { %v1077_v24 = vadd.f32 %v1873_v21, %v1035_v22 }
 0x219   :  { %v1109_v29 = vmax.f32 %v1077_v24, 0.0 }
 0x21c   :  { %v803_v23 = vpop.f32.mrf.mxu2 }
 0x21d   :  { %v1037_v25 = vadd.f32 %v1036_v20, %v803_v23 }
 0x21f   :  { %v1078_v28 = vadd.f32 %v1873_v21, %v1037_v25 }
 0x221   :  { %v1110_v30 = vmax.f32 %v1078_v28, 0.0 }
 0x223   :  { %v1656_v31 = vpack.c.bf16 %v1110_v30, %v1109_v29 }
 0x224   :  { %v806_v27 = vpop.f32.mrf.mxu2 }
 0x225   :  { %1680 = vst [vmem:[%s1960_s5 + $0x68] sm:$0xff] %v1656_v31   ;;  %v1040_v33 = vadd.f32 %v1039_v26, %v806_v27 }
 0x227   :  { %v1079_v35 = vadd.f32 %v1873_v21, %v1040_v33 }
 0x229   :  { %v1111_v38 = vmax.f32 %v1079_v35, 0.0 }
 0x22c   :  { %v808_v34 = vpop.f32.mrf.mxu2 }
 0x22d   :  { %v1042_v36 = vadd.f32 %v1041_v32, %v808_v34 }
 0x22f   :  { %v1080_v37 = vadd.f32 %v1873_v21, %v1042_v36 }
 0x231   :  { %v1112_v39 = vmax.f32 %v1080_v37, 0.0 }
 0x233   :  { %v1661_v41 = vpack.c.bf16 %v1112_v39, %v1111_v38 }
 0x234   :  { %v811_v42 = vpop.f32.mrf.mxu2 }
 0x235   :  { %1681 = vst [vmem:[%s1960_s5 + $0x70] sm:$0xff] %v1661_v41   ;;  %v1045_v43 = vadd.f32 %v1044_v40, %v811_v42 }
 0x237   :  { %v1081_v47 = vadd.f32 %v1873_v21, %v1045_v43 }
 0x239   :  { %v1113_v50 = vmax.f32 %v1081_v47, 0.0 }
 0x23c   :  { %v813_v45 = vpop.f32.mrf.mxu2 }
 0x23d   :  { %v1047_v48 = vadd.f32 %v1046_v44, %v813_v45 }
 0x23f   :  { %v1082_v49 = vadd.f32 %v1873_v21, %v1047_v48 }
 0x241   :  { %v1114_v46 = vmax.f32 %v1082_v49, 0.0 }
 0x243   :  { %v1666_v51 = vpack.c.bf16 %v1114_v46, %v1113_v50 }
 0x245   :  { %1682 = vst [vmem:[%s1960_s5 + $0x78] sm:$0xff] %v1666_v51  }
 0x246   :  { %1183 = vsyncpa [#allocation3], 1 }
 0x247   :  { %1184 = vsyncpa [#allocation5], 1 }
 0x248   :  { %1185 = vsyncpa [#allocation8], 1 }

</bundles_post_ra>
